<compile_context>
chip_gen: v7x
topology: tpu7x:2x2x1
jax: 0.10.0
libtpu: 0.0.40
codegen_flags: <defaults>
</compile_context>

<pallas_src>
import functools
from typing import NamedTuple

import jax
import jax.numpy as jnp
from jax.experimental import pallas as pl
from jax.experimental.pallas import tpu as pltpu


def _round_up(x, m):
    return (x + m - 1) // m * m


def _ceil_div(a, b):
    return -(-a // b)


def _vmem_capacity_bytes():
    """Best-effort physical-VMEM query (per TensorCore); conservative fallback."""
    try:
        info = pltpu.get_tpu_info()
        cap = getattr(info, "vmem_capacity_bytes", None)
        if cap:
            return int(cap)
    except Exception:
        pass
    return 64 * 1024 * 1024  # v7x per-TC value (most restrictive)


# --------------------------------------------------------------------------- #
# Kernel
# --------------------------------------------------------------------------- #
def _fused_embed_kernel(idx_ref, hi_ref, lo_ref, out_ref, *, n_atom_cols, seg_sizes):
    """out[rows, H_pad] = onehot_counts(idx) @ (hi + lo), segment-restricted.

    idx_ref : (rows, F+2) int32   -- F atom columns, in-degree, out-degree.
    hi_ref  : (K_total, H_pad) bf16  fused table, upper bf16 half of the f32 table.
    lo_ref  : (K_total, H_pad) bf16  residual (hi + lo ~= f32 table).
    Index value -1 matches no lane -> contributes exactly zero (used for the
    graph-token rows' unused columns and for grid padding rows).
    """
    rows = idx_ref.shape[0]
    va, vi, vo = seg_sizes
    idx = idx_ref[...]                                           # (rows, F+2)

    def seg_slab(col_start, n_cols, width):
        # One iota per segment (built once per grid step, reused for all columns
        # of that segment).  Accumulate compares in f32 (exact), cast once.
        lanes = jax.lax.broadcasted_iota(jnp.int32, (rows, width), 1)
        slab = (lanes == idx[:, col_start:col_start + 1]).astype(jnp.float32)
        for f in range(1, n_cols):
            c = col_start + f
            slab = slab + (lanes == idx[:, c:c + 1]).astype(jnp.float32)
        # Counts are small integers (<= F) -> exact in bf16.
        return slab.astype(jnp.bfloat16)

    slab_a = seg_slab(0, n_atom_cols, va)                        # atom counts
    slab_i = seg_slab(n_atom_cols, 1, vi)                        # in-degree one-hot
    slab_o = seg_slab(n_atom_cols + 1, 1, vo)                    # out-degree one-hot

    def seg_matmul(slab, start, size):
        # Static, sublane-aligned (multiple-of-128) slices of the resident table.
        hi = hi_ref[start:start + size, :]
        lo = lo_ref[start:start + size, :]
        return (jnp.dot(slab, hi, preferred_element_type=jnp.float32)
                + jnp.dot(slab, lo, preferred_element_type=jnp.float32))

    acc = seg_matmul(slab_a, 0, va)
    acc = acc + seg_matmul(slab_i, va, vi)
    acc = acc + seg_matmul(slab_o, va + vi, vo)
    out_ref[...] = acc                                           # lane-dense f32 store


# --------------------------------------------------------------------------- #
# Hoisted (once-per-parameter-set) fused table construction
# --------------------------------------------------------------------------- #
class GraphNodeFeatureTables(NamedTuple):
    hi: jax.Array          # [K_total, H_pad] bf16 (upper half of the f32 table)
    lo: jax.Array          # [K_total, H_pad] bf16 (residual; hi + lo ~= f32 table)
    seg_sizes: tuple       # (va_pad, vi_pad, vo_pad) static ints
    gtok_slot: int         # atom-segment row holding the graph-token vector
    hidden_dim: int        # unpadded H
    h_pad: int             # lane-aligned H


def prepare_graph_node_feature_tables(atom_tab, in_tab, out_tab, graph_token,
                                      *, lane_align=128):
    """Build the fused hi/lo tables ONCE per parameter set.

    This is hoisted out of the per-forward path so static weights are not
    re-padded / re-concatenated / re-split on every invocation.
    """
    H = atom_tab.shape[1]
    h_pad = _round_up(H, lane_align)
    # +1 guarantees a spare atom-segment slot for the graph token.
    va = _round_up(atom_tab.shape[0] + 1, lane_align)
    vi = _round_up(in_tab.shape[0], lane_align)
    vo = _round_up(out_tab.shape[0], lane_align)
    gtok_slot = atom_tab.shape[0]

    def pad(tab, rows):
        tab = tab.astype(jnp.float32)
        return jnp.pad(tab, ((0, rows - tab.shape[0]), (0, h_pad - H)))

    atom_seg = pad(atom_tab, va).at[gtok_slot, :H].set(
        graph_token[0].astype(jnp.float32))
    fused = jnp.concatenate([atom_seg, pad(in_tab, vi), pad(out_tab, vo)], axis=0)

    # hi/lo bf16 split of the f32 table: hi + lo reconstructs the table to
    # ~2^-16 relative error, so two bf16 MXU passes (f32 accumulation) give
    # effectively f32-accurate results at bf16 MXU rate.
    hi = fused.astype(jnp.bfloat16)
    lo = (fused - hi.astype(jnp.float32)).astype(jnp.bfloat16)
    return GraphNodeFeatureTables(hi=hi, lo=lo, seg_sizes=(va, vi, vo),
                                  gtok_slot=gtok_slot, hidden_dim=H, h_pad=h_pad)


# --------------------------------------------------------------------------- #
# Forward pass
# --------------------------------------------------------------------------- #
def graph_node_feature(input_nodes, in_degree, out_degree, tables,
                       *, rows_per_block=None):
    G, N, F = input_nodes.shape
    H, h_pad = tables.hidden_dim, tables.h_pad
    va, vi, vo = tables.seg_sizes
    k_total = va + vi + vo
    n_idx = F + 2
    total_rows = G * (N + 1)

    # ---- wrapper-side index plumbing (tiny int32 tensors) -------------------
    node_rows = jnp.concatenate(
        [input_nodes.astype(jnp.int32),
         in_degree.astype(jnp.int32)[..., None],
         out_degree.astype(jnp.int32)[..., None]], axis=-1)          # (G, N, F+2)
    # One extra row per graph: column 0 selects the graph-token slot of the
    # atom segment; -1 columns match no lane and contribute zero.
    tok_rows = jnp.full((G, 1, n_idx), -1, dtype=jnp.int32)
    tok_rows = tok_rows.at[:, :, 0].set(tables.gtok_slot)
    idx = jnp.concatenate([tok_rows, node_rows], axis=1).reshape(total_rows, n_idx)

    # ---- generation-aware row tiling ----------------------------------------
    vmem_cap = _vmem_capacity_bytes()
    if rows_per_block is None:
        # v5e/v6e (128 MiB VMEM): bigger M tiles amortize per-step overhead;
        # v7x (64 MiB): keep tiles modest.
        rows_per_block = 512 if vmem_cap >= (100 << 20) else 256
    rows_cap = max(8, _round_up(rows_per_block, 8))

    n_steps = max(1, _ceil_div(total_rows, rows_cap))
    if total_rows >= 16:
        n_steps = max(n_steps, 2)   # >= 2 blocks so the parallel axis can shard across 2 TCs
    rows = _round_up(_ceil_div(total_rows, n_steps), 8)   # minimal-waste block height
    rows_pad = rows * n_steps
    if rows_pad != total_rows:
        # Padded rows use -1 indices -> exact zeros; sliced off below.
        idx = jnp.pad(idx, ((0, rows_pad - total_rows), (0, 0)), constant_values=-1)

    kernel = functools.partial(_fused_embed_kernel, n_atom_cols=F,
                               seg_sizes=(va, vi, vo))

    cost = pl.CostEstimate(
        flops=2 * 2 * rows_pad * k_total * h_pad,            # hi + lo MXU passes
        transcendentals=0,
        bytes_accessed=(rows_pad * n_idx * 4                 # indices
                        + 2 * k_total * h_pad * 2            # hi + lo bf16 tables
                        + rows_pad * h_pad * 4),              # f32 output
    )

    def run(table_pipeline_mode):
        table_buffers = 1 if table_pipeline_mode is not None else 2

        def table_spec():
            if table_pipeline_mode is None:
                return pl.BlockSpec((k_total, h_pad), lambda i: (0, 0))
            return pl.BlockSpec((k_total, h_pad), lambda i: (0, 0),
                                pipeline_mode=table_pipeline_mode)

        vmem_bytes = (2 * rows * (n_idx + h_pad) * 4               # dbl-buffered idx + out
                      + table_buffers * 2 * k_total * h_pad * 2    # resident hi/lo tables
                      + rows * k_total * 2                         # bf16 slabs
                      + rows * h_pad * 4)                          # f32 accumulator
        vmem_limit = max(2 * vmem_bytes, 8 << 20)
        vmem_limit = min(vmem_limit, int(0.6 * vmem_cap))          # v7x: ~38 MiB ceiling
        vmem_limit = int(max(vmem_limit, vmem_bytes + (1 << 20)))  # never self-starve

        return pl.pallas_call(
            kernel,
            out_shape=jax.ShapeDtypeStruct((rows_pad, h_pad), jnp.float32),
            grid_spec=pltpu.PrefetchScalarGridSpec(
                num_scalar_prefetch=0,
                grid=(n_steps,),
                in_specs=[
                    pl.BlockSpec((rows, n_idx), lambda i: (i, 0)),   # row-tiled indices
                    table_spec(),                                     # resident hi table
                    table_spec(),                                     # resident lo table
                ],
                out_specs=pl.BlockSpec((rows, h_pad), lambda i: (i, 0)),  # lane-dense out
            ),
            compiler_params=pltpu.CompilerParams(
                dimension_semantics=("parallel",),
                vmem_limit_bytes=vmem_limit,
            ),
            cost_estimate=cost,
        )(idx, tables.hi, tables.lo)

    try:
        # Resident (constant index_map) tables: request single buffering to
        # halve their VMEM footprint (decisive on v7x's 64 MiB per-TC VMEM).
        out_flat = run(pl.Buffered(1))
    except Exception:
        # Fallback for jax versions/configs that reject Buffered(1): default
        # double-buffering (correctness identical, slightly more VMEM).
        out_flat = run(None)

    return out_flat[:total_rows, :H].reshape(G, N + 1, H)


# --------------------------------------------------------------------------- #
# Pure-JAX reference (matches the PyTorch forward)
# --------------------------------------------------------------------------- #
def reference(input_nodes, in_degree, out_degree, atom_tab, in_tab, out_tab,
              graph_token):
    node_feature = (jnp.take(atom_tab, input_nodes, axis=0).sum(axis=-2)
                    + jnp.take(in_tab, in_degree, axis=0)
                    + jnp.take(out_tab, out_degree, axis=0))
    G = input_nodes.shape[0]
    gtok = jnp.broadcast_to(graph_token[None, :, :], (G, 1, graph_token.shape[1]))
    return jnp.concatenate([gtok, node_feature], axis=1)


if __name__ == "__main__":
    # Small, forward-consistent shapes.
    num_heads = 4           # stored only; unused in forward
    num_atoms = 16
    num_in_degree = 8
    num_out_degree = 8
    hidden_dim = 32
    n_layers = 2            # only scales nn.Linear init (no Linear in this module)

    G, N, F = 2, 8, 3       # n_graph, n_node, atom features per node

    key = jax.random.PRNGKey(0)
    k1, k2, k3, k4, k5, k6, k7 = jax.random.split(key, 7)

    # Deterministic parameter init matching init_params (Embedding: N(0, 0.02)).
    # Note: init_params overwrites the padding_idx row too, so no zeroing of row 0.
    atom_tab = (0.02 * jax.random.normal(k1, (num_atoms + 1, hidden_dim))).astype(jnp.float32)
    in_tab = (0.02 * jax.random.normal(k2, (num_in_degree, hidden_dim))).astype(jnp.float32)
    out_tab = (0.02 * jax.random.normal(k3, (num_out_degree, hidden_dim))).astype(jnp.float32)
    graph_token = (0.02 * jax.random.normal(k4, (1, hidden_dim))).astype(jnp.float32)

    input_nodes = jax.random.randint(k5, (G, N, F), 0, num_atoms + 1, dtype=jnp.int32)
    in_degree = jax.random.randint(k6, (G, N), 0, num_in_degree, dtype=jnp.int32)
    out_degree = jax.random.randint(k7, (G, N), 0, num_out_degree, dtype=jnp.int32)

    # Fused hi/lo tables built once (hoisted out of the per-forward path).
    tables = prepare_graph_node_feature_tables(atom_tab, in_tab, out_tab, graph_token)

    out = graph_node_feature(input_nodes, in_degree, out_degree, tables)
    out = jax.block_until_ready(out)

    ref = reference(input_nodes, in_degree, out_degree,
                    atom_tab, in_tab, out_tab, graph_token)
    assert out.shape == (G, N + 1, hidden_dim)
    # hi/lo bf16 split keeps error well below 1e-5 for 0.02-scale weights;
    # 2e-5 tolerance leaves margin for MXU accumulation-order differences.
    assert jnp.allclose(out, ref, atol=2e-5, rtol=2e-5), \
        float(jnp.max(jnp.abs(out - ref)))

    print("KERNEL_OK")
</pallas_src>

<mosaic_0001>
module attributes {stable_mosaic.version = 11 : i64} {
  func.func @_fused_embed_kernel(%arg0: i32, %arg1: memref<16x5xi32, #tpu.memory_space<vmem>>, %arg2: memref<384x128xbf16, #tpu.memory_space<vmem>>, %arg3: memref<384x128xbf16, #tpu.memory_space<vmem>>, %arg4: memref<16x128xf32, #tpu.memory_space<vmem>>) attributes {dimension_semantics = [#tpu.dimension_semantics<parallel>], iteration_bounds = array<i64: 2>, scalar_prefetch = 0 : i64, scratch_operands = 0 : i64, tpu.core_type = #tpu.core_type<tc>, window_params = [{transform_indices = @transform_0, window_bounds = array<i64: 16, 5>}, {pipeline_mode = #tpu.pipeline_mode<synchronous>, transform_indices = @transform_1, window_bounds = array<i64: 384, 128>}, {pipeline_mode = #tpu.pipeline_mode<synchronous>, transform_indices = @transform_2, window_bounds = array<i64: 384, 128>}, {transform_indices = @transform_3, window_bounds = array<i64: 16, 128>}]} {
    %c0 = arith.constant 0 : index
    %c0_0 = arith.constant 0 : index
    %0 = vector.load %arg1[%c0, %c0_0] : memref<16x5xi32, #tpu.memory_space<vmem>>, vector<16x5xi32>
    %1 = tpu.iota {dimensions = array<i32: 1>} : vector<16x128xi32>
    %2 = vector.extract_strided_slice %0 {offsets = [0, 0], sizes = [16, 1], strides = [1, 1]} : vector<16x5xi32> to vector<16x1xi32>
    %3 = vector.broadcast %2 : vector<16x1xi32> to vector<16x128xi32>
    %4 = arith.cmpi eq, %1, %3 : vector<16x128xi32>
    %5 = arith.extui %4 : vector<16x128xi1> to vector<16x128xi32>
    %6 = arith.sitofp %5 : vector<16x128xi32> to vector<16x128xf32>
    %7 = vector.extract_strided_slice %0 {offsets = [0, 1], sizes = [16, 1], strides = [1, 1]} : vector<16x5xi32> to vector<16x1xi32>
    %8 = vector.broadcast %7 : vector<16x1xi32> to vector<16x128xi32>
    %9 = arith.cmpi eq, %1, %8 : vector<16x128xi32>
    %10 = arith.extui %9 : vector<16x128xi1> to vector<16x128xi32>
    %11 = arith.sitofp %10 : vector<16x128xi32> to vector<16x128xf32>
    %12 = arith.addf %6, %11 : vector<16x128xf32>
    %13 = vector.extract_strided_slice %0 {offsets = [0, 2], sizes = [16, 1], strides = [1, 1]} : vector<16x5xi32> to vector<16x1xi32>
    %14 = vector.broadcast %13 : vector<16x1xi32> to vector<16x128xi32>
    %15 = arith.cmpi eq, %1, %14 : vector<16x128xi32>
    %16 = arith.extui %15 : vector<16x128xi1> to vector<16x128xi32>
    %17 = arith.sitofp %16 : vector<16x128xi32> to vector<16x128xf32>
    %18 = arith.addf %12, %17 : vector<16x128xf32>
    %19 = arith.truncf %18 : vector<16x128xf32> to vector<16x128xbf16>
    %20 = tpu.iota {dimensions = array<i32: 1>} : vector<16x128xi32>
    %21 = vector.extract_strided_slice %0 {offsets = [0, 3], sizes = [16, 1], strides = [1, 1]} : vector<16x5xi32> to vector<16x1xi32>
    %22 = vector.broadcast %21 : vector<16x1xi32> to vector<16x128xi32>
    %23 = arith.cmpi eq, %20, %22 : vector<16x128xi32>
    %24 = arith.extui %23 : vector<16x128xi1> to vector<16x128xi32>
    %25 = arith.sitofp %24 : vector<16x128xi32> to vector<16x128xf32>
    %26 = arith.truncf %25 : vector<16x128xf32> to vector<16x128xbf16>
    %27 = tpu.iota {dimensions = array<i32: 1>} : vector<16x128xi32>
    %28 = vector.extract_strided_slice %0 {offsets = [0, 4], sizes = [16, 1], strides = [1, 1]} : vector<16x5xi32> to vector<16x1xi32>
    %29 = vector.broadcast %28 : vector<16x1xi32> to vector<16x128xi32>
    %30 = arith.cmpi eq, %27, %29 : vector<16x128xi32>
    %31 = arith.extui %30 : vector<16x128xi1> to vector<16x128xi32>
    %32 = arith.sitofp %31 : vector<16x128xi32> to vector<16x128xf32>
    %33 = arith.truncf %32 : vector<16x128xf32> to vector<16x128xbf16>
    %c0_1 = arith.constant 0 : index
    %c0_2 = arith.constant 0 : index
    %34 = vector.load %arg2[%c0_1, %c0_2] : memref<384x128xbf16, #tpu.memory_space<vmem>>, vector<128x128xbf16>
    %c0_3 = arith.constant 0 : index
    %c0_4 = arith.constant 0 : index
    %35 = vector.load %arg3[%c0_3, %c0_4] : memref<384x128xbf16, #tpu.memory_space<vmem>>, vector<128x128xbf16>
    %cst = arith.constant dense<0.000000e+00> : vector<16x128xf32>
    %36 = tpu.matmul %19, %34, %cst {dimension_numbers = #tpu.dot_dimension_numbers<[1], [0], [0], [1], [0, 0, 1, 1], [], []>} : vector<16x128xbf16>, vector<128x128xbf16>, vector<16x128xf32> -> vector<16x128xf32>
    %cst_5 = arith.constant dense<0.000000e+00> : vector<16x128xf32>
    %37 = tpu.matmul %19, %35, %cst_5 {dimension_numbers = #tpu.dot_dimension_numbers<[1], [0], [0], [1], [0, 0, 1, 1], [], []>} : vector<16x128xbf16>, vector<128x128xbf16>, vector<16x128xf32> -> vector<16x128xf32>
    %38 = arith.addf %36, %37 : vector<16x128xf32>
    %c128 = arith.constant 128 : index
    %c0_6 = arith.constant 0 : index
    %39 = vector.load %arg2[%c128, %c0_6] : memref<384x128xbf16, #tpu.memory_space<vmem>>, vector<128x128xbf16>
    %c128_7 = arith.constant 128 : index
    %c0_8 = arith.constant 0 : index
    %40 = vector.load %arg3[%c128_7, %c0_8] : memref<384x128xbf16, #tpu.memory_space<vmem>>, vector<128x128xbf16>
    %cst_9 = arith.constant dense<0.000000e+00> : vector<16x128xf32>
    %41 = tpu.matmul %26, %39, %cst_9 {dimension_numbers = #tpu.dot_dimension_numbers<[1], [0], [0], [1], [0, 0, 1, 1], [], []>} : vector<16x128xbf16>, vector<128x128xbf16>, vector<16x128xf32> -> vector<16x128xf32>
    %cst_10 = arith.constant dense<0.000000e+00> : vector<16x128xf32>
    %42 = tpu.matmul %26, %40, %cst_10 {dimension_numbers = #tpu.dot_dimension_numbers<[1], [0], [0], [1], [0, 0, 1, 1], [], []>} : vector<16x128xbf16>, vector<128x128xbf16>, vector<16x128xf32> -> vector<16x128xf32>
    %43 = arith.addf %41, %42 : vector<16x128xf32>
    %44 = arith.addf %38, %43 : vector<16x128xf32>
    %c256 = arith.constant 256 : index
    %c0_11 = arith.constant 0 : index
    %45 = vector.load %arg2[%c256, %c0_11] : memref<384x128xbf16, #tpu.memory_space<vmem>>, vector<128x128xbf16>
    %c256_12 = arith.constant 256 : index
    %c0_13 = arith.constant 0 : index
    %46 = vector.load %arg3[%c256_12, %c0_13] : memref<384x128xbf16, #tpu.memory_space<vmem>>, vector<128x128xbf16>
    %cst_14 = arith.constant dense<0.000000e+00> : vector<16x128xf32>
    %47 = tpu.matmul %33, %45, %cst_14 {dimension_numbers = #tpu.dot_dimension_numbers<[1], [0], [0], [1], [0, 0, 1, 1], [], []>} : vector<16x128xbf16>, vector<128x128xbf16>, vector<16x128xf32> -> vector<16x128xf32>
    %cst_15 = arith.constant dense<0.000000e+00> : vector<16x128xf32>
    %48 = tpu.matmul %33, %46, %cst_15 {dimension_numbers = #tpu.dot_dimension_numbers<[1], [0], [0], [1], [0, 0, 1, 1], [], []>} : vector<16x128xbf16>, vector<128x128xbf16>, vector<16x128xf32> -> vector<16x128xf32>
    %49 = arith.addf %47, %48 : vector<16x128xf32>
    %50 = arith.addf %44, %49 : vector<16x128xf32>
    %c0_16 = arith.constant 0 : index
    %c0_17 = arith.constant 0 : index
    %51 = vector.load %arg4[%c0_16, %c0_17] : memref<16x128xf32, #tpu.memory_space<vmem>>, vector<16x128xf32>
    tpu.vector_store %arg4[%c0_16, %c0_17], %50 {strides = array<i32>} : memref<16x128xf32, #tpu.memory_space<vmem>>, vector<16x128xf32>,
    return
  }
  func.func @transform_0(%arg0: i32) -> (i32, i32) {
    %c0_i32 = arith.constant 0 : i32
    %c0_i32_0 = arith.constant 0 : i32
    return %arg0, %c0_i32 : i32, i32
  }
  func.func @transform_1(%arg0: i32) -> (i32, i32) {
    %c0_i32 = arith.constant 0 : i32
    %c0_i32_0 = arith.constant 0 : i32
    %c0_i32_1 = arith.constant 0 : i32
    return %c0_i32, %c0_i32_0 : i32, i32
  }
  func.func @transform_2(%arg0: i32) -> (i32, i32) {
    %c0_i32 = arith.constant 0 : i32
    %c0_i32_0 = arith.constant 0 : i32
    %c0_i32_1 = arith.constant 0 : i32
    return %c0_i32, %c0_i32_0 : i32, i32
  }
  func.func @transform_3(%arg0: i32) -> (i32, i32) {
    %c0_i32 = arith.constant 0 : i32
    %c0_i32_0 = arith.constant 0 : i32
    return %arg0, %c0_i32 : i32, i32
  }
}

module attributes {stable_mosaic.version = 11 : i64} {
  func.func @_fused_embed_kernel(%arg0: i32, %arg1: memref<16x5xi32, #tpu.memory_space<vmem>>, %arg2: memref<384x128xbf16, #tpu.memory_space<vmem>>, %arg3: memref<384x128xbf16, #tpu.memory_space<vmem>>, %arg4: memref<16x128xf32, #tpu.memory_space<vmem>>) attributes {dimension_semantics = [#tpu.dimension_semantics<parallel>], iteration_bounds = array<i64: 2>, scalar_prefetch = 0 : i64, scratch_operands = 0 : i64, tpu.core_type = #tpu.core_type<tc>, window_params = [{transform_indices = @transform_0, window_bounds = array<i64: 16, 5>}, {pipeline_mode = #tpu.pipeline_mode<synchronous>, transform_indices = @transform_1, window_bounds = array<i64: 384, 128>}, {pipeline_mode = #tpu.pipeline_mode<synchronous>, transform_indices = @transform_2, window_bounds = array<i64: 384, 128>}, {transform_indices = @transform_3, window_bounds = array<i64: 16, 128>}]} {
    %c0 = arith.constant 0 : index
    %c0_0 = arith.constant 0 : index
    %0 = vector.load %arg1[%c0, %c0_0] : memref<16x5xi32, #tpu.memory_space<vmem>>, vector<16x5xi32>
    %1 = tpu.iota {dimensions = array<i32: 1>} : vector<16x128xi32>
    %2 = vector.extract_strided_slice %0 {offsets = [0, 0], sizes = [16, 1], strides = [1, 1]} : vector<16x5xi32> to vector<16x1xi32>
    %3 = vector.broadcast %2 : vector<16x1xi32> to vector<16x128xi32>
    %4 = arith.cmpi eq, %1, %3 : vector<16x128xi32>
    %5 = arith.extui %4 : vector<16x128xi1> to vector<16x128xi32>
    %6 = arith.sitofp %5 : vector<16x128xi32> to vector<16x128xf32>
    %7 = vector.extract_strided_slice %0 {offsets = [0, 1], sizes = [16, 1], strides = [1, 1]} : vector<16x5xi32> to vector<16x1xi32>
    %8 = vector.broadcast %7 : vector<16x1xi32> to vector<16x128xi32>
    %9 = arith.cmpi eq, %1, %8 : vector<16x128xi32>
    %10 = arith.extui %9 : vector<16x128xi1> to vector<16x128xi32>
    %11 = arith.sitofp %10 : vector<16x128xi32> to vector<16x128xf32>
    %12 = arith.addf %6, %11 : vector<16x128xf32>
    %13 = vector.extract_strided_slice %0 {offsets = [0, 2], sizes = [16, 1], strides = [1, 1]} : vector<16x5xi32> to vector<16x1xi32>
    %14 = vector.broadcast %13 : vector<16x1xi32> to vector<16x128xi32>
    %15 = arith.cmpi eq, %1, %14 : vector<16x128xi32>
    %16 = arith.extui %15 : vector<16x128xi1> to vector<16x128xi32>
    %17 = arith.sitofp %16 : vector<16x128xi32> to vector<16x128xf32>
    %18 = arith.addf %12, %17 : vector<16x128xf32>
    %19 = arith.truncf %18 : vector<16x128xf32> to vector<16x128xbf16>
    %20 = tpu.iota {dimensions = array<i32: 1>} : vector<16x128xi32>
    %21 = vector.extract_strided_slice %0 {offsets = [0, 3], sizes = [16, 1], strides = [1, 1]} : vector<16x5xi32> to vector<16x1xi32>
    %22 = vector.broadcast %21 : vector<16x1xi32> to vector<16x128xi32>
    %23 = arith.cmpi eq, %20, %22 : vector<16x128xi32>
    %24 = arith.extui %23 : vector<16x128xi1> to vector<16x128xi32>
    %25 = arith.sitofp %24 : vector<16x128xi32> to vector<16x128xf32>
    %26 = arith.truncf %25 : vector<16x128xf32> to vector<16x128xbf16>
    %27 = tpu.iota {dimensions = array<i32: 1>} : vector<16x128xi32>
    %28 = vector.extract_strided_slice %0 {offsets = [0, 4], sizes = [16, 1], strides = [1, 1]} : vector<16x5xi32> to vector<16x1xi32>
    %29 = vector.broadcast %28 : vector<16x1xi32> to vector<16x128xi32>
    %30 = arith.cmpi eq, %27, %29 : vector<16x128xi32>
    %31 = arith.extui %30 : vector<16x128xi1> to vector<16x128xi32>
    %32 = arith.sitofp %31 : vector<16x128xi32> to vector<16x128xf32>
    %33 = arith.truncf %32 : vector<16x128xf32> to vector<16x128xbf16>
    %c0_1 = arith.constant 0 : index
    %c0_2 = arith.constant 0 : index
    %34 = vector.load %arg2[%c0_1, %c0_2] : memref<384x128xbf16, #tpu.memory_space<vmem>>, vector<128x128xbf16>
    %c0_3 = arith.constant 0 : index
    %c0_4 = arith.constant 0 : index
    %35 = vector.load %arg3[%c0_3, %c0_4] : memref<384x128xbf16, #tpu.memory_space<vmem>>, vector<128x128xbf16>
    %cst = arith.constant dense<0.000000e+00> : vector<16x128xf32>
    %36 = tpu.matmul %19, %34, %cst {dimension_numbers = #tpu.dot_dimension_numbers<[1], [0], [0], [1], [0, 0, 1, 1], [], []>} : vector<16x128xbf16>, vector<128x128xbf16>, vector<16x128xf32> -> vector<16x128xf32>
    %cst_5 = arith.constant dense<0.000000e+00> : vector<16x128xf32>
    %37 = tpu.matmul %19, %35, %cst_5 {dimension_numbers = #tpu.dot_dimension_numbers<[1], [0], [0], [1], [0, 0, 1, 1], [], []>} : vector<16x128xbf16>, vector<128x128xbf16>, vector<16x128xf32> -> vector<16x128xf32>
    %38 = arith.addf %36, %37 : vector<16x128xf32>
    %c128 = arith.constant 128 : index
    %c0_6 = arith.constant 0 : index
    %39 = vector.load %arg2[%c128, %c0_6] : memref<384x128xbf16, #tpu.memory_space<vmem>>, vector<128x128xbf16>
    %c128_7 = arith.constant 128 : index
    %c0_8 = arith.constant 0 : index
    %40 = vector.load %arg3[%c128_7, %c0_8] : memref<384x128xbf16, #tpu.memory_space<vmem>>, vector<128x128xbf16>
    %cst_9 = arith.constant dense<0.000000e+00> : vector<16x128xf32>
    %41 = tpu.matmul %26, %39, %cst_9 {dimension_numbers = #tpu.dot_dimension_numbers<[1], [0], [0], [1], [0, 0, 1, 1], [], []>} : vector<16x128xbf16>, vector<128x128xbf16>, vector<16x128xf32> -> vector<16x128xf32>
    %cst_10 = arith.constant dense<0.000000e+00> : vector<16x128xf32>
    %42 = tpu.matmul %26, %40, %cst_10 {dimension_numbers = #tpu.dot_dimension_numbers<[1], [0], [0], [1], [0, 0, 1, 1], [], []>} : vector<16x128xbf16>, vector<128x128xbf16>, vector<16x128xf32> -> vector<16x128xf32>
    %43 = arith.addf %41, %42 : vector<16x128xf32>
    %44 = arith.addf %38, %43 : vector<16x128xf32>
    %c256 = arith.constant 256 : index
    %c0_11 = arith.constant 0 : index
    %45 = vector.load %arg2[%c256, %c0_11] : memref<384x128xbf16, #tpu.memory_space<vmem>>, vector<128x128xbf16>
    %c256_12 = arith.constant 256 : index
    %c0_13 = arith.constant 0 : index
    %46 = vector.load %arg3[%c256_12, %c0_13] : memref<384x128xbf16, #tpu.memory_space<vmem>>, vector<128x128xbf16>
    %cst_14 = arith.constant dense<0.000000e+00> : vector<16x128xf32>
    %47 = tpu.matmul %33, %45, %cst_14 {dimension_numbers = #tpu.dot_dimension_numbers<[1], [0], [0], [1], [0, 0, 1, 1], [], []>} : vector<16x128xbf16>, vector<128x128xbf16>, vector<16x128xf32> -> vector<16x128xf32>
    %cst_15 = arith.constant dense<0.000000e+00> : vector<16x128xf32>
    %48 = tpu.matmul %33, %46, %cst_15 {dimension_numbers = #tpu.dot_dimension_numbers<[1], [0], [0], [1], [0, 0, 1, 1], [], []>} : vector<16x128xbf16>, vector<128x128xbf16>, vector<16x128xf32> -> vector<16x128xf32>
    %49 = arith.addf %47, %48 : vector<16x128xf32>
    %50 = arith.addf %44, %49 : vector<16x128xf32>
    %c0_16 = arith.constant 0 : index
    %c0_17 = arith.constant 0 : index
    %51 = vector.load %arg4[%c0_16, %c0_17] : memref<16x128xf32, #tpu.memory_space<vmem>>, vector<16x128xf32>
    tpu.vector_store %arg4[%c0_16, %c0_17], %50 {strides = array<i32>} : memref<16x128xf32, #tpu.memory_space<vmem>>, vector<16x128xf32>,
    return
  }
  func.func @transform_0(%arg0: i32) -> (i32, i32) {
    %c0_i32 = arith.constant 0 : i32
    %c0_i32_0 = arith.constant 0 : i32
    return %arg0, %c0_i32 : i32, i32
  }
  func.func @transform_1(%arg0: i32) -> (i32, i32) {
    %c0_i32 = arith.constant 0 : i32
    %c0_i32_0 = arith.constant 0 : i32
    %c0_i32_1 = arith.constant 0 : i32
    return %c0_i32, %c0_i32_0 : i32, i32
  }
  func.func @transform_2(%arg0: i32) -> (i32, i32) {
    %c0_i32 = arith.constant 0 : i32
    %c0_i32_0 = arith.constant 0 : i32
    %c0_i32_1 = arith.constant 0 : i32
    return %c0_i32, %c0_i32_0 : i32, i32
  }
  func.func @transform_3(%arg0: i32) -> (i32, i32) {
    %c0_i32 = arith.constant 0 : i32
    %c0_i32_0 = arith.constant 0 : i32
    return %arg0, %c0_i32 : i32, i32
  }
}

</mosaic_0001>

<bundles_post_ra>
// kernel: tpu_custom_call.1
= control target key start
LH: loop header
LB: loop body
LE: loop exit
PB: predicated region body
PF: predicated region fallthrough
CT: control target
= control target key end

     0   :  { %8 = vsyncpa [#allocation3], 0  ;;  %s1846_s0 = inlined_call_operand.vmem [shape: s32[32,5], index: 0, kind: input, shape index: {}]   ;;  %s1847_s1 = inlined_call_operand.hbm [shape: bf16[384,128], index: 1, kind: input, shape index: {}]   ;;  %s1848_s2 = inlined_call_operand.hbm [shape: bf16[384,128], index: 2, kind: input, shape index: {}]   ;;  %s1849_s3 = inlined_call_operand.hbm [shape: f32[32,128], index: 3, kind: output, shape index: {}]  }
   0x1   :  { %9 = vsyncpa [#allocation6], 0 }
   0x2   :  { %10 = vsyncpa [#allocation4], 0 }
   0x3   :  { %12 = vsyncpa [#allocation4 + $0x1], 0  ;;  %s1574_s12 = smov 0   ;;  %s1576_s13 = smov 0  }
   0x4   :  { %s1578_s14 = smov 0   ;;  %s1580_s15 = smov 0  }
   0x5 LB: > { %s1595_s16 = sadd.s32 4294967295, %s1537_s15   ;;  %s1008_s17 = sadd.s32 4294967294, %s1537_s15   ;;  %s1537_s15 = sphi %s1580_s15, %s1871_s15   ;;  %s1533_s14 = sphi %s1578_s14, %s1870_s14   ;;  %s1529_s13 = sphi %s1576_s13, %s1869_s13   ;;  %s1525_s12 = sphi %s1574_s12, %s1868_s12  }
   0x6   : > { %s1599_s18 = sadd.s32 1, %s1537_s15   ;;  %s93_s19 = sadd.s32 1, %s1533_s14 }
   0x7   : > { %s90_s20 = ssub.s32 %s1537_s15, %s1599_s18  ;;  %p103_p0 = scmp.ne.s32.totalorder %s1533_s14, %s1529_s13 }
   0x8   : > { %p91_p1 = scmp.eq.s32.totalorder %s90_s20, 0  ;;  %p104_p2 = scmp.eq.s32.totalorder %s1595_s16, 1 }
   0x9   : > { %p109_p3 = scmp.ne.s32.totalorder %s1529_s13, %s1525_s12  ;;  %p110_p4 = scmp.eq.s32.totalorder %s1008_s17, 1 }
   0xa   : > { %s1610_s21 = scalar_select %p91_p1, %s1533_s14, %s93_s19  }
   0xb   : > { %p1612_p5 = por %p104_p2, %p103_p0  ;;  %p1616_p6 = por %p110_p4, %p109_p3 }
   0xc   : > { %p1009_p7 = scmp.ge.s32.totalorder %s1537_s15, 1  ;;  %p117_p8 = scmp.lt.s32.totalorder %s1537_s15, 3 }
   0xd   : > { %s1853_s22 = scalar_select %p1612_p5, 1, 0 }
   0xe   : > { %s1854_s23 = scalar_select %p1616_p6, 1, 0 }
   0xf   : > { %p1850_p9 = scmp.eq.s32.totalorder %s1595_s16, 0  ;;  %p1623_p10 = pnand %p1009_p7, %p117_p8 }
  0x10   : > { %s1539_s25 = smov [#allocation2]   ;;  %s1540_s28 = smov [#allocation5]  }
  0x11   : > { %s1855_s24 = scalar_select %p1623_p10, 1, 0 }
  0x12   : > { %s129_s26 = sshll.u32 %s1539_s25, 4  ;;  %p1293_p11 = pneg %p1623_p10  ;;  %s130_s26 = int_to_ptr.vmem [resolvable:$true] %s129_s26 }
  0x13   : > { %s142_s29 = sshll.u32 %s1540_s28, 4  ;;  %s1411_s5 = scalar_lea.hbm %s1847_s1, 3072  ;;  %s1635_s29 = int_to_ptr.vmem [resolvable:$true] %s142_s29 }
  0x14   : > { %p1631_p12 = pnand %p1850_p9, %p1293_p11  ;;  %p1412_p13 = scmp.ne.s32.totalorder %s1847_s1, %s1411_s5 }
  0x15   : > { %p1418_p3 = scmp.lt.u32.totalorder %s1411_s5, %s1847_s1 }
  0x16   : > { %p1413_p0 = pneg %p1631_p12 }
  0x18   : > { %p1414_p1 = pnand %p1413_p0, %p1412_p13 }
  0x1a   : > { %p1415_p2 = pneg %p1414_p1 }
  0x1c   : > { %p1420_p4 = pnand %p1418_p3, %p1415_p2 }
  0x1e   : > { %1423 = shalt.err (!%p1420_p4)
}
  0x1f   : > { %s1424_s10 = scalar_lea.vmem %s130_s26, 3072  ;;  %p1432_p9 = scmp.lt.s32.totalorder %s130_s26, %s130_s26 }
  0x20   : > { %p1425_p7 = scmp.ne.s32.totalorder %s130_s26, %s1424_s10  ;;  %p1433_p6 = scmp.lt.s32.totalorder %s1424_s10, %s1424_s10 }
  0x22   : > { %p1427_p8 = pnand %p1425_p7, %p1413_p0  ;;  %p1434_p5 = por %p1433_p6, %p1432_p9 }
  0x24   : > { %p1428_p11 = pneg %p1427_p8 }
  0x26   : > { %p1435_p10 = pnand %p1434_p5, %p1428_p11 }
  0x28   : > { %1438 = shalt.err (!%p1435_p10)
}
  0x29   : > { %s1541_s11 = smov 64   ;;  %s1542_s17 = smov 4  }
  0x2a   : > { %1296 = dma.hbm_to_vmem [thread:$0]  (!%p1631_p12), %s1847_s1, 3072, %s130_s26, [#allocation3], %s1541_s11, %s1541_s11, %s1542_s17  }
  0x2b   : > { %s1439_s30 = scalar_lea.hbm %s1848_s2, 3072 }
  0x2c   : > { %p1440_p13 = scmp.ne.s32.totalorder %s1848_s2, %s1439_s30  ;;  %p1446_p9 = scmp.lt.u32.totalorder %s1439_s30, %s1848_s2 }
  0x2e   : > { %p1442_p5 = pnand %p1440_p13, %p1413_p0 }
  0x30   : > { %p1443_p6 = pneg %p1442_p5 }
  0x32   : > { %p1448_p10 = pnand %p1446_p9, %p1443_p6 }
  0x34   : > { %1451 = shalt.err (!%p1448_p10)
}
  0x35   : > { %s1452_s26 = scalar_lea.vmem %s1635_s29, 3072  ;;  %p1460_p4 = scmp.lt.s32.totalorder %s1635_s29, %s1635_s29 }
  0x36   : > { %p1453_p1 = scmp.ne.s32.totalorder %s1635_s29, %s1452_s26  ;;  %p1461_p7 = scmp.lt.s32.totalorder %s1452_s26, %s1452_s26 }
  0x38   : > { %p1455_p2 = pnand %p1453_p1, %p1413_p0  ;;  %p1462_p8 = por %p1461_p7, %p1460_p4 }
  0x3a   : > { %p1456_p3 = pneg %p1455_p2 }
  0x3c   : > { %p1463_p11 = pnand %p1462_p8, %p1456_p3 }
  0x3e   : > { %1466 = shalt.err (!%p1463_p11)
}
  0x3f   : > { %1299 = dma.hbm_to_vmem [thread:$0]  (!%p1631_p12), %s1848_s2, 3072, %s1635_s29, [#allocation6], %s1541_s11, %s1541_s11, %s1542_s17  }
  0x40   : > { %p1857_p13 = scmp.ne.s32.totalorder %s1855_s24, 0 }
  0x41   : > { %p1858_p5 = scmp.eq.s32.totalorder (!%p1857_p13), %s1595_s16, 0 }
  0x42   : > { %167 = sbr.rel (%p1857_p13) target bundleno = 524 (0x20c), region = 32 }
  0x49   : > { %1512 = dma.done.wait (%p1858_p5), [#allocation3], 3072   ;;  %p1859_p0 = pmov %p1858_p5 }
  0x4b   : > { %1514 = vsyncadd (%p1859_p0), [#allocation3], 4294964224  ;;  %p1860_p6 = pmov %p1859_p0 }
  0x4c   : > { %p1861_p9 = pmov %p1859_p0 }
  0x4d   : > { %1516 = dma.done.wait (%p1860_p6), [#allocation6], 3072  }
  0x4e   : > { %1518 = vsyncadd (%p1861_p9), [#allocation6], 4294964224  ;;  %s1017_s27 = sshll.u32 %s1595_s16, 1  ;;  %v1543_v0 = vmov 1   ;;  %v1544_v1 = vmov 0   ;;  %v1545_v2 = vmov 0.0   ;;  %v205_v24 = vlaneseq }
  0x4f   : > { %1356 = vset.pattern.permute.xlu1 %v1543_v0  ;;  %1355 = vset.pattern.permute.xlu0 %v1544_v1  ;;  %p196_p12 = scmp.lt.s32.totalorder %s1017_s27, 3  ;;  %v1363_v5 = vld [vmem:[#allocation5] sm:$0xff]   ;;  %v1365_v7 = vld [vmem:[#allocation5 + $0x8] sm:$0xff]   ;;  %v1367_v9 = vld [vmem:[#allocation5 + $0x10] sm:$0xff]   ;;  %v1546_v11 = vmov 2   ;;  %v1547_v14 = vmov 3  }
  0x50   : > { %1145 = vmatprep.subr.bf16.mxu1 %v1545_v2  ;;  %1205 = vmatprep.subr.bf16.mxu0 %v1545_v2  ;;  %v1364_v6 = vld [vmem:[#allocation2 + $0x40] sm:$0xff]   ;;  %v1366_v8 = vld [vmem:[#allocation2 + $0x48] sm:$0xff]   ;;  %v1368_v10 = vld [vmem:[#allocation2 + $0x50] sm:$0xff]   ;;  %vm1548_vm0 = vmmov 0   ;;  %v1549_v17 = vmov 4   ;;  %v1720_v25 = vand.u32 127, %v205_v24 }
  0x51   : > { %s1873_s27 = smov (!%p196_p12, %s1017_s27), 3  ;;  %1146 = vmatpush3.bf16.msra.mxu1 %v1363_v5  ;;  %1206 = vmatpush3.bf16.msra.mxu0 %v1364_v6  ;;  %v1369_v12 = vld [vmem:[#allocation5 + $0x18] sm:$0xff]   ;;  %v1371_v15 = vld [vmem:[#allocation5 + $0x20] sm:$0xff]   ;;  %v1373_v18 = vld [vmem:[#allocation5 + $0x28] sm:$0xff]   ;;  %v1550_v48 = vmov 1.0|1.0  }
  0x52   : > { %s1018_s24 = sshll.u32 %s1873_s27, 3  ;;  %1147 = vmatprep.subr.bf16.mxu1 %v1545_v2  ;;  %1207 = vmatprep.subr.bf16.mxu0 %v1545_v2  ;;  %v1370_v13 = vld [vmem:[#allocation2 + $0x58] sm:$0xff]   ;;  %v1372_v16 = vld [vmem:[#allocation2 + $0x60] sm:$0xff]   ;;  %v1374_v19 = vld [vmem:[#allocation2 + $0x68] sm:$0xff]   ;;  %s192_s17 = sand.u32 1, %s1529_s13  }
  0x53   : > { %s199_s11 = scalar_lea.vmem %s1846_s0, %s1018_s24  ;;  %1161 = vmatprep.mubr.msk.bf16.mxu1 %vm1548_vm0, %v1545_v2  ;;  %1221 = vmatprep.mubr.msk.bf16.mxu0 %vm1548_vm0, %v1545_v2  ;;  %v1375_v20 = vld [vmem:[#allocation5 + $0x30] sm:$0xff]   ;;  %v1377_v22 = vld [vmem:[#allocation5 + $0x38] sm:$0xff]   ;;  %v1379_v42 = vld [vmem:[#allocation2] sm:$0xff]   ;;  %s1016_s19 = sshll.u32 %s192_s17, 4 }
  0x54   : > { %v203_v3 = vld [vmem:[%s199_s11] sm:$0xff]  ;;  %v204_v4 = vld [vmem:[%s199_s11 + $0x8] sm:$0xff]  ;;  %v1376_v21 = vld [vmem:[#allocation2 + $0x70] sm:$0xff]   ;;  %s194_s20 = scalar_lea.vmem [#allocation7], %s1016_s19  ;;  %s1090_s28 = sshll.u32 %s1595_s16, 8 }
  0x55   : > { %220 = vperm.xlu1 %1356, %v203_v3   ;;  %208 = vperm.xlu0 %1355, %v203_v3   ;;  %v1378_v23 = vld [vmem:[#allocation2 + $0x78] sm:$0xff]   ;;  %v1380_v46 = vld [vmem:[#allocation5 + $0x80] sm:$0xff]   ;;  %v1381_v49 = vld [vmem:[#allocation2 + $0x8] sm:$0xff]   ;;  %s924_s25 = sshll.u32 %s194_s20, 4  ;;  %s1803_s5 = scalar_lea.hbm %s1849_s3, %s1090_s28  ;;  %s1798_s25 = int_to_ptr.vmem [resolvable:$true] %s924_s25 }
  0x56   : > { %1148 = vmatpush3.bf16.msra.mxu1 %v1365_v7  ;;  %1208 = vmatpush3.bf16.msra.mxu0 %v1366_v8  ;;  %v1382_v50 = vld [vmem:[#allocation5 + $0x88] sm:$0xff]   ;;  %v1383_v51 = vld [vmem:[#allocation2 + $0x10] sm:$0xff]   ;;  %v1385_v53 = vld [vmem:[#allocation2 + $0x18] sm:$0xff]   ;;  %s1805_s16 = scalar_lea.sflag [#allocation4], %s192_s17  ;;  %s1467_s6 = scalar_lea.vmem %s1798_s25, 256 }
  0x57   : > { %1149 = vmatprep.subr.bf16.mxu1 %v1545_v2  ;;  %1209 = vmatprep.subr.bf16.mxu0 %v1545_v2  ;;  %v1384_v52 = vld [vmem:[#allocation5 + $0x90] sm:$0xff]   ;;  %v1386_v54 = vld [vmem:[#allocation5 + $0x98] sm:$0xff]   ;;  %v1387_v55 = vld [vmem:[#allocation2 + $0x20] sm:$0xff]   ;;  %p1468_p10 = scmp.ne.s32.totalorder %s1798_s25, %s1467_s6  ;;  %p1866_p1 = scmp.ne.s32.totalorder %s1853_s22, 0 }
  0x58   : > { %v1388_v56 = vld [vmem:[#allocation5 + $0xa0] sm:$0xff]   ;;  %v1389_v57 = vld [vmem:[#allocation2 + $0x28] sm:$0xff]   ;;  %v1391_v60 = vld [vmem:[#allocation2 + $0x30] sm:$0xff]   ;;  %s1551_s7 = smov [#allocation7]  }
  0x59   : > { %223 = vperm.xlu1 %1356, %v204_v4   ;;  %211 = vperm.xlu0 %1355, %v204_v4   ;;  %v1390_v58 = vld [vmem:[#allocation5 + $0xa8] sm:$0xff]   ;;  %v1392_v61 = vld [vmem:[#allocation5 + $0xb0] sm:$0xff]   ;;  %v1393_v62 = vld [vmem:[#allocation2 + $0x38] sm:$0xff]   ;;  %p1469_p2 = pnand %p1468_p10, %p1866_p1  ;;  %s1471_s26 = sshll.u32 %s1551_s7, 4  ;;  %s1472_s26 = int_to_ptr.vmem [resolvable:$false] %s1471_s26 }
  0x5a   : > { %1150 = vmatpush3.bf16.msra.mxu1 %v1367_v9  ;;  %1210 = vmatpush3.bf16.msra.mxu0 %v1368_v10  ;;  %v1394_v0 = vld [vmem:[#allocation5 + $0xb8] sm:$0xff]   ;;  %v1395_v1 = vld [vmem:[#allocation5 + $0x40] sm:$0xff]   ;;  %v1397_v5 = vld [vmem:[#allocation5 + $0x48] sm:$0xff]   ;;  %s1473_s8 = scalar_lea.vmem %s1472_s26, 512  ;;  %p1474_p4 = scmp.lt.s32.totalorder %s1798_s25, %s1472_s26 }
  0x5b   : > { %1151 = vmatprep.subr.bf16.mxu1 %v1545_v2  ;;  %1211 = vmatprep.subr.bf16.mxu0 %v1545_v2  ;;  %v1398_v6 = vld [vmem:[#allocation2 + $0x88] sm:$0xff]   ;;  %v1399_v7 = vld [vmem:[#allocation5 + $0x50] sm:$0xff]   ;;  %v1401_v9 = vld [vmem:[#allocation5 + $0x58] sm:$0xff]   ;;  %p1470_p3 = pneg %p1469_p2  ;;  %p1475_p7 = scmp.lt.s32.totalorder %s1473_s8, %s1467_s6 }
  0x5c   : > { %v1400_v8 = vld [vmem:[#allocation2 + $0x90] sm:$0xff]   ;;  %v1402_v10 = vld [vmem:[#allocation2 + $0x98] sm:$0xff]  }
  0x5d   : > { %1358 = vset.pattern.permute.xlu1 %v1546_v11  ;;  %1357 = vset.pattern.permute.xlu0 %v1546_v11  ;;  %v1403_v11 = vld [vmem:[#allocation5 + $0x60] sm:$0xff]   ;;  %p1476_p8 = por %p1475_p7, %p1474_p4 }
  0x5e   : > { %237 = vperm.xlu1 %1358, %v204_v4   ;;  %234 = vperm.xlu0 %1357, %v203_v3  }
  0x5f   : > { %1152 = vmatpush3.bf16.msra.mxu1 %v1369_v12  ;;  %1212 = vmatpush3.bf16.msra.mxu0 %v1370_v13  ;;  %v1404_v12 = vld [vmem:[#allocation2 + $0xa0] sm:$0xff]   ;;  %v1405_v13 = vld [vmem:[#allocation5 + $0x68] sm:$0xff]   ;;  %p1477_p11 = pnand %p1476_p8, %p1470_p3 }
  0x60   : > { %1153 = vmatprep.subr.bf16.mxu1 %v1545_v2  ;;  %1213 = vmatprep.subr.bf16.mxu0 %v1545_v2 }
  0x62   : > { %1359 = vset.pattern.permute.xlu1 %v1547_v14  ;;  %1360 = vset.pattern.permute.xlu0 %v1547_v14  ;;  %v1406_v14 = vld [vmem:[#allocation2 + $0xa8] sm:$0xff]  }
  0x63   : > { %249 = vperm.xlu1 %1359, %v203_v3   ;;  %252 = vperm.xlu0 %1360, %v204_v4  }
  0x64   : > { %1154 = vmatpush3.bf16.msra.mxu1 %v1371_v15  ;;  %1214 = vmatpush3.bf16.msra.mxu0 %v1372_v16  ;;  %v1407_v15 = vld [vmem:[#allocation5 + $0x70] sm:$0xff]  }
  0x65   : > { %1155 = vmatprep.subr.bf16.mxu1 %v1545_v2  ;;  %1215 = vmatprep.subr.bf16.mxu0 %v1545_v2  ;;  %v1408_v16 = vld [vmem:[#allocation2 + $0xb0] sm:$0xff]  }
  0x67   : > { %1361 = vset.pattern.permute.xlu1 %v1549_v17  ;;  %1362 = vset.pattern.permute.xlu0 %v1549_v17  ;;  %v1409_v17 = vld [vmem:[#allocation5 + $0x78] sm:$0xff]  }
  0x68   : > { %262 = vperm.xlu1 %1361, %v203_v3   ;;  %1156 = vmatpush3.bf16.msra.mxu1 %v1373_v18  ;;  %v1396_v3 = vld [vmem:[#allocation2 + $0x80] sm:$0xff]   ;;  %v1410_v18 = vld [vmem:[#allocation2 + $0xb8] sm:$0xff]  }
  0x69   : > { %1216 = vmatpush3.bf16.msra.mxu0 %v1374_v19  ;;  %1157 = vmatprep.subr.bf16.mxu1 %v1545_v2 }
  0x6a   : > { %1217 = vmatprep.subr.bf16.mxu0 %v1545_v2 }
  0x6c   : > { %265 = vperm.xlu1 %1361, %v204_v4   ;;  %1158 = vmatpush3.bf16.msra.mxu1 %v1375_v20 }
  0x6d   : > { %1218 = vmatpush3.bf16.msra.mxu0 %v1376_v21  ;;  %1159 = vmatprep.subr.bf16.mxu1 %v1545_v2 }
  0x6e   : > { %1219 = vmatprep.subr.bf16.mxu0 %v1545_v2 }
  0x70   : > { %1160 = vmatpush3.bf16.msra.mxu1 %v1377_v22 }
  0x71   : > { %1220 = vmatpush3.bf16.msra.mxu0 %v1378_v23  ;;  %1165 = vmatprep.subr.bf16.mxu1 %v1545_v2 }
  0x72   : > { %1225 = vmatprep.subr.bf16.mxu0 %v1545_v2 }
  0xd4   : > { %v221_v26 = vpop.permute.xlu1 %220  ;;  %v209_v27 = vpop.permute.xlu0 %208 }
  0xd5   : > { %vm225_vm1 = vcmp.eq.s32.totalorder %v1720_v25, %v221_v26  ;;  %vm213_vm2 = vcmp.eq.s32.totalorder %v1720_v25, %v209_v27 }
  0xd6   : > { %v1021_v30 = vsel %vm225_vm1, 1.0, %v1545_v2  ;;  %v1019_v31 = vsel %vm213_vm2, 1.0, %v1545_v2 }
  0xd7   : > { %v231_v36 = vadd.f32 %v1021_v30, %v1019_v31 }
  0xd8   : > { %v224_v28 = vpop.permute.xlu1 %223  ;;  %v212_v29 = vpop.permute.xlu0 %211 }
  0xd9   : > { %vm226_vm3 = vcmp.eq.s32.totalorder %v1720_v25, %v224_v28  ;;  %vm214_vm4 = vcmp.eq.s32.totalorder %v1720_v25, %v212_v29 }
  0xda   : > { %v1022_v32 = vsel %vm226_vm3, 1.0, %v1545_v2  ;;  %v1020_v33 = vsel %vm214_vm4, 1.0, %v1545_v2 }
  0xdb   : > { %v232_v37 = vadd.f32 %v1022_v32, %v1020_v33 }
  0xdd   : > { %v238_v34 = vpop.permute.xlu1 %237  ;;  %v235_v35 = vpop.permute.xlu0 %234 }
  0xde   : > { %vm240_vm5 = vcmp.eq.s32.totalorder %v1720_v25, %v238_v34  ;;  %vm239_vm6 = vcmp.eq.s32.totalorder %v1720_v25, %v235_v35 }
  0xdf   : > { %v1024_v38 = vsel %vm240_vm5, 1.0, %v1545_v2  ;;  %v1023_v39 = vsel %vm239_vm6, 1.0, %v1545_v2 }
  0xe0   : > { %v246_v40 = vadd.f32 %v1024_v38, %v232_v37  ;;  %v245_v41 = vadd.f32 %v1023_v39, %v231_v36 }
  0xe2   : > { %v250_v43 = vpop.permute.xlu1 %249  ;;  %v253_v44 = vpop.permute.xlu0 %252  ;;  %v247_v45 = vpack.c.bf16 %v246_v40, %v245_v41 }
  0xe3   : > { %vm254_vm7 = vcmp.eq.s32.totalorder %v1720_v25, %v250_v43  ;;  %vm255_vm8 = vcmp.eq.s32.totalorder %v1720_v25, %v253_v44 }
  0xe4   : > { %vm1736_vm9 = vmpackc.low %vm255_vm8, %vm254_vm7  ;;  %1162 = vmatmul.mubr.bf16.vlgmr.msra.gmra.mrb[0].mxu1 %v247_v45 }
  0xe5   : > { %1166 = vmatpush3.bf16.msra.mxu1 %v1379_v42  ;;  %1222 = vmatmul.mubr.msk.bf16.vlgmr.msra.gmra.mrb[0].mxu0 %vm1736_vm9, %v1550_v48 }
  0xe6   : > { %1226 = vmatpush3.bf16.msra.mxu0 %v1380_v46  ;;  %1167 = vmatprep.subr.bf16.mxu1 %v1545_v2 }
  0xe7   : > { %1227 = vmatprep.subr.bf16.mxu0 %v1545_v2  ;;  %1181 = vmatprep.mubr.msk.bf16.mxu1 %vm1548_vm0, %v1545_v2  ;;  %v263_v59 = vpop.permute.xlu1 %262 }
  0xe8   : > { %1241 = vmatprep.mubr.msk.bf16.mxu0 %vm1548_vm0, %v1545_v2  ;;  %vm267_vm10 = vcmp.eq.s32.totalorder %v1720_v25, %v263_v59 }
  0xe9   : > { %1168 = vmatpush3.bf16.msra.mxu1 %v1381_v49 }
  0xea   : > { %1228 = vmatpush3.bf16.msra.mxu0 %v1382_v50  ;;  %1169 = vmatprep.subr.bf16.mxu1 %v1545_v2 }
  0xeb   : > { %1229 = vmatprep.subr.bf16.mxu0 %v1545_v2  ;;  %v266_v63 = vpop.permute.xlu1 %265 }
  0xec   : > { %vm268_vm11 = vcmp.eq.s32.totalorder %v1720_v25, %v266_v63 }
  0xed   : > { %1170 = vmatpush3.bf16.msra.mxu1 %v1383_v51  ;;  %vm1765_vm12 = vmpackc.low %vm268_vm11, %vm267_vm10 }
  0xee   : > { %1230 = vmatpush3.bf16.msra.mxu0 %v1384_v52  ;;  %1171 = vmatprep.subr.bf16.mxu1 %v1545_v2 }
  0xef   : > { %1231 = vmatprep.subr.bf16.mxu0 %v1545_v2 }
  0xf1   : > { %1172 = vmatpush3.bf16.msra.mxu1 %v1385_v53 }
  0xf2   : > { %1232 = vmatpush3.bf16.msra.mxu0 %v1386_v54  ;;  %1173 = vmatprep.subr.bf16.mxu1 %v1545_v2 }
  0xf3   : > { %1233 = vmatprep.subr.bf16.mxu0 %v1545_v2 }
  0xf5   : > { %1174 = vmatpush3.bf16.msra.mxu1 %v1387_v55 }
  0xf6   : > { %1234 = vmatpush3.bf16.msra.mxu0 %v1388_v56  ;;  %1175 = vmatprep.subr.bf16.mxu1 %v1545_v2 }
  0xf7   : > { %1235 = vmatprep.subr.bf16.mxu0 %v1545_v2 }
  0xf9   : > { %1176 = vmatpush3.bf16.msra.mxu1 %v1389_v57 }
  0xfa   : > { %1236 = vmatpush3.bf16.msra.mxu0 %v1390_v58  ;;  %1177 = vmatprep.subr.bf16.mxu1 %v1545_v2 }
  0xfb   : > { %1237 = vmatprep.subr.bf16.mxu0 %v1545_v2 }
  0xfd   : > { %1178 = vmatpush3.bf16.msra.mxu1 %v1391_v60 }
  0xfe   : > { %1238 = vmatpush3.bf16.msra.mxu0 %v1392_v61  ;;  %1179 = vmatprep.subr.bf16.mxu1 %v1545_v2 }
  0xff   : > { %1239 = vmatprep.subr.bf16.mxu0 %v1545_v2 }
 0x101   : > { %1180 = vmatpush3.bf16.msra.mxu1 %v1393_v62 }
 0x102   : > { %1240 = vmatpush3.bf16.msra.mxu0 %v1394_v0  ;;  %1185 = vmatprep.subr.bf16.mxu1 %v1545_v2 }
 0x103   : > { %1245 = vmatprep.subr.bf16.mxu0 %v1545_v2 }
 0x104   : > { %1182 = vmatmul.mubr.bf16.vlgmr.msra.gmra.mrb[0].mxu1 %v247_v45 }
 0x105   : > { %1186 = vmatpush3.bf16.msra.mxu1 %v1395_v1  ;;  %1242 = vmatmul.mubr.msk.bf16.vlgmr.msra.gmra.mrb[0].mxu0 %vm1765_vm12, %v1550_v48 }
 0x106   : > { %1246 = vmatpush3.bf16.msra.mxu0 %v1396_v3  ;;  %1187 = vmatprep.subr.bf16.mxu1 %v1545_v2 }
 0x107   : > { %1247 = vmatprep.subr.bf16.mxu0 %v1545_v2  ;;  %1201 = vmatprep.mubr.msk.bf16.mxu1 %vm1548_vm0, %v1545_v2 }
 0x108   : > { %1261 = vmatprep.mubr.msk.bf16.mxu0 %vm1548_vm0, %v1545_v2 }
 0x109   : > { %1188 = vmatpush3.bf16.msra.mxu1 %v1397_v5 }
 0x10a   : > { %1248 = vmatpush3.bf16.msra.mxu0 %v1398_v6  ;;  %1189 = vmatprep.subr.bf16.mxu1 %v1545_v2 }
 0x10b   : > { %1249 = vmatprep.subr.bf16.mxu0 %v1545_v2 }
 0x10d   : > { %1190 = vmatpush3.bf16.msra.mxu1 %v1399_v7 }
 0x10e   : > { %1250 = vmatpush3.bf16.msra.mxu0 %v1400_v8  ;;  %1191 = vmatprep.subr.bf16.mxu1 %v1545_v2 }
 0x10f   : > { %1251 = vmatprep.subr.bf16.mxu0 %v1545_v2 }
 0x111   : > { %1192 = vmatpush3.bf16.msra.mxu1 %v1401_v9 }
 0x112   : > { %1252 = vmatpush3.bf16.msra.mxu0 %v1402_v10  ;;  %1193 = vmatprep.subr.bf16.mxu1 %v1545_v2 }
 0x113   : > { %1253 = vmatprep.subr.bf16.mxu0 %v1545_v2 }
 0x115   : > { %1194 = vmatpush3.bf16.msra.mxu1 %v1403_v11 }
 0x116   : > { %1254 = vmatpush3.bf16.msra.mxu0 %v1404_v12  ;;  %1195 = vmatprep.subr.bf16.mxu1 %v1545_v2 }
 0x117   : > { %1255 = vmatprep.subr.bf16.mxu0 %v1545_v2 }
 0x119   : > { %1196 = vmatpush3.bf16.msra.mxu1 %v1405_v13 }
 0x11a   : > { %1256 = vmatpush3.bf16.msra.mxu0 %v1406_v14  ;;  %1197 = vmatprep.subr.bf16.mxu1 %v1545_v2 }
 0x11b   : > { %1257 = vmatprep.subr.bf16.mxu0 %v1545_v2 }
 0x11d   : > { %1198 = vmatpush3.bf16.msra.mxu1 %v1407_v15 }
 0x11e   : > { %1258 = vmatpush3.bf16.msra.mxu0 %v1408_v16  ;;  %1199 = vmatprep.subr.bf16.mxu1 %v1545_v2 }
 0x11f   : > { %1259 = vmatprep.subr.bf16.mxu0 %v1545_v2 }
 0x121   : > { %1200 = vmatpush3.bf16.msra.mxu1 %v1409_v17 }
 0x122   : > { %1260 = vmatpush3.bf16.msra.mxu0 %v1410_v18 }
 0x124   : > { %1202 = vmatmul.mubr.msk.bf16.vlgmr.msra.gmra.mrb[0].mxu1 %vm1736_vm9, %v1550_v48 }
 0x125   : > { %1262 = vmatmul.mubr.msk.bf16.vlgmr.msra.gmra.mrb[0].mxu0 %vm1765_vm12, %v1550_v48 }
 0x1f7   : > { %v598_v19 = vpop.f32.mrb[0].mxu1 }
 0x1f8   : > { %v1203_v20 = vpop.f32.mrb[1].mxu1  ;;  %v899_v21 = vpop.f32.mrb[0].mxu0 }
 0x1f9   : > { %v1265_v2 = vadd.f32 %v899_v21, %v598_v19  ;;  %v601_v22 = vpop.f32.mrb[2].mxu1  ;;  %v1263_v23 = vpop.f32.mrb[1].mxu0 }
 0x1fa   : > { %v1204_v24 = vpop.f32.mrb[3].mxu1  ;;  %v902_v25 = vpop.f32.mrb[2].mxu0 }
 0x1fb   : > { %908 = vst [vmem:[%s194_s20] sm:$0xff] %v1265_v2  ;;  %v1266_v26 = vadd.f32 %v902_v25, %v601_v22  ;;  %v1264_v27 = vpop.f32.mrb[3].mxu0 }
 0x1fd   : > { %909 = vst [vmem:[%s194_s20 + $0x8] sm:$0xff] %v1266_v26 }
 0x1fe   : > { %1480 = shalt.err (!%p1477_p11)
}
 0x1ff   : > { %s1481_s9 = scalar_lea.hbm %s1803_s5, 256  ;;  %s1485_s29 = scalar_lea.hbm %s1849_s3, 512 }
 0x200   : > { %p1482_p13 = scmp.ne.s32.totalorder %s1803_s5, %s1481_s9  ;;  %p1486_p6 = scmp.lt.u32.totalorder %s1803_s5, %s1849_s3 }
 0x201   : > { %p1487_p9 = scmp.lt.u32.totalorder %s1485_s29, %s1481_s9  ;;  %p1489_p10 = scmp.lt.u32.totalorder %s1481_s9, %s1803_s5 }
 0x202   : > { %p1483_p5 = pnand %p1482_p13, %p1866_p1 }
 0x203   : > { %p1488_p12 = por %p1487_p9, %p1486_p6 }
 0x204   : > { %p1484_p0 = pneg %p1483_p5 }
 0x205   : > { %p1490_p2 = por %p1489_p10, %p1488_p12 }
 0x207   : > { %p1491_p3 = pnand %p1490_p2, %p1484_p0 }
 0x209   : > { %1494 = shalt.err (!%p1491_p3)
}
 0x20a   : > { %s1552_s17 = smov 128   ;;  %s1553_s19 = smov 8  }
 0x20b   : > { %1291 = dma.vmem_to_hbm [thread:$0]  (%p1866_p1), %s1798_s25, 256, %s1803_s5, %s1805_s16, %s1552_s17, %s1552_s17, %s1553_s19  }
 0x20c PF: > { %p1308_p4 = scmp.ge.s32.totalorder %s1537_s15, 2  ;;  %s939_s20 = sand.u32 1, %s1525_s12  }
 0x20d   : > { %p1867_p7 = scmp.ne.s32.totalorder %s1854_s23, 0  ;;  %s940_s28 = scalar_lea.sflag [#allocation4], %s939_s20 }
 0x20f   : > { %p1301_p8 = pnand %p1308_p4, %p1867_p7 }
 0x211   : > { %1520 = dma.done.wait (!%p1301_p8), %s940_s28, 256  }
 0x212   : > { %1522 = vsyncadd (!%p1301_p8), %s940_s28, 4294967040  ;;  %p15_p11 = scmp.ge.s32.totalorder %s1599_s18, 4   ;;  %s1868_s12 = smov %s1529_s13 }
 0x213   : > { %s1869_s13 = smov %s1533_s14  ;;  %s1870_s14 = smov %s1610_s21 }
 0x214   : > { %s1871_s15 = smov %s1599_s18  ;;  %17 = sbr.rel (!%p15_p11) target bundleno = 5 (0x5), region = 76 }
 0x21b   :  { %945 = vsyncpa [#allocation3], 1 }
 0x21c   :  { %947 = vsyncpa [#allocation3 + $0x1], 1 }
 0x21d   :  { %948 = vsyncpa [#allocation6], 1 }
 0x21e   :  { %949 = vsyncpa [#allocation4], 1 }
 0x21f   :  { %951 = vsyncpa [#allocation4 + $0x1], 1 }

// kernel: tpu_custom_call.1
= control target key start
LH: loop header
LB: loop body
LE: loop exit
PB: predicated region body
PF: predicated region fallthrough
CT: control target
= control target key end

     0   :  { %8 = vsyncpa [#allocation3], 0  ;;  %s1846_s0 = inlined_call_operand.vmem [shape: s32[32,5], index: 0, kind: input, shape index: {}]   ;;  %s1847_s1 = inlined_call_operand.hbm [shape: bf16[384,128], index: 1, kind: input, shape index: {}]   ;;  %s1848_s2 = inlined_call_operand.hbm [shape: bf16[384,128], index: 2, kind: input, shape index: {}]   ;;  %s1849_s3 = inlined_call_operand.hbm [shape: f32[32,128], index: 3, kind: output, shape index: {}]  }
   0x1   :  { %9 = vsyncpa [#allocation6], 0 }
   0x2   :  { %10 = vsyncpa [#allocation4], 0 }
   0x3   :  { %12 = vsyncpa [#allocation4 + $0x1], 0  ;;  %s1574_s12 = smov 0   ;;  %s1576_s13 = smov 0  }
   0x4   :  { %s1578_s14 = smov 0   ;;  %s1580_s15 = smov 0  }
   0x5 LB: > { %s1595_s16 = sadd.s32 4294967295, %s1537_s15   ;;  %s1008_s17 = sadd.s32 4294967294, %s1537_s15   ;;  %s1537_s15 = sphi %s1580_s15, %s1871_s15   ;;  %s1533_s14 = sphi %s1578_s14, %s1870_s14   ;;  %s1529_s13 = sphi %s1576_s13, %s1869_s13   ;;  %s1525_s12 = sphi %s1574_s12, %s1868_s12  }
   0x6   : > { %s1599_s18 = sadd.s32 1, %s1537_s15   ;;  %s93_s19 = sadd.s32 1, %s1533_s14 }
   0x7   : > { %s90_s20 = ssub.s32 %s1537_s15, %s1599_s18  ;;  %p103_p0 = scmp.ne.s32.totalorder %s1533_s14, %s1529_s13 }
   0x8   : > { %p91_p1 = scmp.eq.s32.totalorder %s90_s20, 0  ;;  %p104_p2 = scmp.eq.s32.totalorder %s1595_s16, 1 }
   0x9   : > { %p109_p3 = scmp.ne.s32.totalorder %s1529_s13, %s1525_s12  ;;  %p110_p4 = scmp.eq.s32.totalorder %s1008_s17, 1 }
   0xa   : > { %s1610_s21 = scalar_select %p91_p1, %s1533_s14, %s93_s19  }
   0xb   : > { %p1612_p5 = por %p104_p2, %p103_p0  ;;  %p1616_p6 = por %p110_p4, %p109_p3 }
   0xc   : > { %p1009_p7 = scmp.ge.s32.totalorder %s1537_s15, 1  ;;  %p117_p8 = scmp.lt.s32.totalorder %s1537_s15, 3 }
   0xd   : > { %s1853_s22 = scalar_select %p1612_p5, 1, 0 }
   0xe   : > { %s1854_s23 = scalar_select %p1616_p6, 1, 0 }
   0xf   : > { %p1850_p9 = scmp.eq.s32.totalorder %s1595_s16, 0  ;;  %p1623_p10 = pnand %p1009_p7, %p117_p8 }
  0x10   : > { %s1539_s25 = smov [#allocation2]   ;;  %s1540_s28 = smov [#allocation5]  }
  0x11   : > { %s1855_s24 = scalar_select %p1623_p10, 1, 0 }
  0x12   : > { %s129_s26 = sshll.u32 %s1539_s25, 4  ;;  %p1293_p11 = pneg %p1623_p10  ;;  %s130_s26 = int_to_ptr.vmem [resolvable:$true] %s129_s26 }
  0x13   : > { %s142_s29 = sshll.u32 %s1540_s28, 4  ;;  %s1411_s5 = scalar_lea.hbm %s1847_s1, 3072  ;;  %s1635_s29 = int_to_ptr.vmem [resolvable:$true] %s142_s29 }
  0x14   : > { %p1631_p12 = pnand %p1850_p9, %p1293_p11  ;;  %p1412_p13 = scmp.ne.s32.totalorder %s1847_s1, %s1411_s5 }
  0x15   : > { %p1418_p3 = scmp.lt.u32.totalorder %s1411_s5, %s1847_s1 }
  0x16   : > { %p1413_p0 = pneg %p1631_p12 }
  0x18   : > { %p1414_p1 = pnand %p1413_p0, %p1412_p13 }
  0x1a   : > { %p1415_p2 = pneg %p1414_p1 }
  0x1c   : > { %p1420_p4 = pnand %p1418_p3, %p1415_p2 }
  0x1e   : > { %1423 = shalt.err (!%p1420_p4)
}
  0x1f   : > { %s1424_s10 = scalar_lea.vmem %s130_s26, 3072  ;;  %p1432_p9 = scmp.lt.s32.totalorder %s130_s26, %s130_s26 }
  0x20   : > { %p1425_p7 = scmp.ne.s32.totalorder %s130_s26, %s1424_s10  ;;  %p1433_p6 = scmp.lt.s32.totalorder %s1424_s10, %s1424_s10 }
  0x22   : > { %p1427_p8 = pnand %p1425_p7, %p1413_p0  ;;  %p1434_p5 = por %p1433_p6, %p1432_p9 }
  0x24   : > { %p1428_p11 = pneg %p1427_p8 }
  0x26   : > { %p1435_p10 = pnand %p1434_p5, %p1428_p11 }
  0x28   : > { %1438 = shalt.err (!%p1435_p10)
}
  0x29   : > { %s1541_s11 = smov 64   ;;  %s1542_s17 = smov 4  }
  0x2a   : > { %1296 = dma.hbm_to_vmem [thread:$0]  (!%p1631_p12), %s1847_s1, 3072, %s130_s26, [#allocation3], %s1541_s11, %s1541_s11, %s1542_s17  }
  0x2b   : > { %s1439_s30 = scalar_lea.hbm %s1848_s2, 3072 }
  0x2c   : > { %p1440_p13 = scmp.ne.s32.totalorder %s1848_s2, %s1439_s30  ;;  %p1446_p9 = scmp.lt.u32.totalorder %s1439_s30, %s1848_s2 }
  0x2e   : > { %p1442_p5 = pnand %p1440_p13, %p1413_p0 }
  0x30   : > { %p1443_p6 = pneg %p1442_p5 }
  0x32   : > { %p1448_p10 = pnand %p1446_p9, %p1443_p6 }
  0x34   : > { %1451 = shalt.err (!%p1448_p10)
}
  0x35   : > { %s1452_s26 = scalar_lea.vmem %s1635_s29, 3072  ;;  %p1460_p4 = scmp.lt.s32.totalorder %s1635_s29, %s1635_s29 }
  0x36   : > { %p1453_p1 = scmp.ne.s32.totalorder %s1635_s29, %s1452_s26  ;;  %p1461_p7 = scmp.lt.s32.totalorder %s1452_s26, %s1452_s26 }
  0x38   : > { %p1455_p2 = pnand %p1453_p1, %p1413_p0  ;;  %p1462_p8 = por %p1461_p7, %p1460_p4 }
  0x3a   : > { %p1456_p3 = pneg %p1455_p2 }
  0x3c   : > { %p1463_p11 = pnand %p1462_p8, %p1456_p3 }
  0x3e   : > { %1466 = shalt.err (!%p1463_p11)
}
  0x3f   : > { %1299 = dma.hbm_to_vmem [thread:$0]  (!%p1631_p12), %s1848_s2, 3072, %s1635_s29, [#allocation6], %s1541_s11, %s1541_s11, %s1542_s17  }
  0x40   : > { %p1857_p13 = scmp.ne.s32.totalorder %s1855_s24, 0 }
  0x41   : > { %p1858_p5 = scmp.eq.s32.totalorder (!%p1857_p13), %s1595_s16, 0 }
  0x42   : > { %167 = sbr.rel (%p1857_p13) target bundleno = 524 (0x20c), region = 32 }
  0x49   : > { %1512 = dma.done.wait (%p1858_p5), [#allocation3], 3072   ;;  %p1859_p0 = pmov %p1858_p5 }
  0x4b   : > { %1514 = vsyncadd (%p1859_p0), [#allocation3], 4294964224  ;;  %p1860_p6 = pmov %p1859_p0 }
  0x4c   : > { %p1861_p9 = pmov %p1859_p0 }
  0x4d   : > { %1516 = dma.done.wait (%p1860_p6), [#allocation6], 3072  }
  0x4e   : > { %1518 = vsyncadd (%p1861_p9), [#allocation6], 4294964224  ;;  %s1017_s27 = sshll.u32 %s1595_s16, 1  ;;  %v1543_v0 = vmov 1   ;;  %v1544_v1 = vmov 0   ;;  %v1545_v2 = vmov 0.0   ;;  %v205_v24 = vlaneseq }
  0x4f   : > { %1356 = vset.pattern.permute.xlu1 %v1543_v0  ;;  %1355 = vset.pattern.permute.xlu0 %v1544_v1  ;;  %p196_p12 = scmp.lt.s32.totalorder %s1017_s27, 3  ;;  %v1363_v5 = vld [vmem:[#allocation5] sm:$0xff]   ;;  %v1365_v7 = vld [vmem:[#allocation5 + $0x8] sm:$0xff]   ;;  %v1367_v9 = vld [vmem:[#allocation5 + $0x10] sm:$0xff]   ;;  %v1546_v11 = vmov 2   ;;  %v1547_v14 = vmov 3  }
  0x50   : > { %1145 = vmatprep.subr.bf16.mxu1 %v1545_v2  ;;  %1205 = vmatprep.subr.bf16.mxu0 %v1545_v2  ;;  %v1364_v6 = vld [vmem:[#allocation2 + $0x40] sm:$0xff]   ;;  %v1366_v8 = vld [vmem:[#allocation2 + $0x48] sm:$0xff]   ;;  %v1368_v10 = vld [vmem:[#allocation2 + $0x50] sm:$0xff]   ;;  %vm1548_vm0 = vmmov 0   ;;  %v1549_v17 = vmov 4   ;;  %v1720_v25 = vand.u32 127, %v205_v24 }
  0x51   : > { %s1873_s27 = smov (!%p196_p12, %s1017_s27), 3  ;;  %1146 = vmatpush3.bf16.msra.mxu1 %v1363_v5  ;;  %1206 = vmatpush3.bf16.msra.mxu0 %v1364_v6  ;;  %v1369_v12 = vld [vmem:[#allocation5 + $0x18] sm:$0xff]   ;;  %v1371_v15 = vld [vmem:[#allocation5 + $0x20] sm:$0xff]   ;;  %v1373_v18 = vld [vmem:[#allocation5 + $0x28] sm:$0xff]   ;;  %v1550_v48 = vmov 1.0|1.0  }
  0x52   : > { %s1018_s24 = sshll.u32 %s1873_s27, 3  ;;  %1147 = vmatprep.subr.bf16.mxu1 %v1545_v2  ;;  %1207 = vmatprep.subr.bf16.mxu0 %v1545_v2  ;;  %v1370_v13 = vld [vmem:[#allocation2 + $0x58] sm:$0xff]   ;;  %v1372_v16 = vld [vmem:[#allocation2 + $0x60] sm:$0xff]   ;;  %v1374_v19 = vld [vmem:[#allocation2 + $0x68] sm:$0xff]   ;;  %s192_s17 = sand.u32 1, %s1529_s13  }
  0x53   : > { %s199_s11 = scalar_lea.vmem %s1846_s0, %s1018_s24  ;;  %1161 = vmatprep.mubr.msk.bf16.mxu1 %vm1548_vm0, %v1545_v2  ;;  %1221 = vmatprep.mubr.msk.bf16.mxu0 %vm1548_vm0, %v1545_v2  ;;  %v1375_v20 = vld [vmem:[#allocation5 + $0x30] sm:$0xff]   ;;  %v1377_v22 = vld [vmem:[#allocation5 + $0x38] sm:$0xff]   ;;  %v1379_v42 = vld [vmem:[#allocation2] sm:$0xff]   ;;  %s1016_s19 = sshll.u32 %s192_s17, 4 }
  0x54   : > { %v203_v3 = vld [vmem:[%s199_s11] sm:$0xff]  ;;  %v204_v4 = vld [vmem:[%s199_s11 + $0x8] sm:$0xff]  ;;  %v1376_v21 = vld [vmem:[#allocation2 + $0x70] sm:$0xff]   ;;  %s194_s20 = scalar_lea.vmem [#allocation7], %s1016_s19  ;;  %s1090_s28 = sshll.u32 %s1595_s16, 8 }
  0x55   : > { %220 = vperm.xlu1 %1356, %v203_v3   ;;  %208 = vperm.xlu0 %1355, %v203_v3   ;;  %v1378_v23 = vld [vmem:[#allocation2 + $0x78] sm:$0xff]   ;;  %v1380_v46 = vld [vmem:[#allocation5 + $0x80] sm:$0xff]   ;;  %v1381_v49 = vld [vmem:[#allocation2 + $0x8] sm:$0xff]   ;;  %s924_s25 = sshll.u32 %s194_s20, 4  ;;  %s1803_s5 = scalar_lea.hbm %s1849_s3, %s1090_s28  ;;  %s1798_s25 = int_to_ptr.vmem [resolvable:$true] %s924_s25 }
  0x56   : > { %1148 = vmatpush3.bf16.msra.mxu1 %v1365_v7  ;;  %1208 = vmatpush3.bf16.msra.mxu0 %v1366_v8  ;;  %v1382_v50 = vld [vmem:[#allocation5 + $0x88] sm:$0xff]   ;;  %v1383_v51 = vld [vmem:[#allocation2 + $0x10] sm:$0xff]   ;;  %v1385_v53 = vld [vmem:[#allocation2 + $0x18] sm:$0xff]   ;;  %s1805_s16 = scalar_lea.sflag [#allocation4], %s192_s17  ;;  %s1467_s6 = scalar_lea.vmem %s1798_s25, 256 }
  0x57   : > { %1149 = vmatprep.subr.bf16.mxu1 %v1545_v2  ;;  %1209 = vmatprep.subr.bf16.mxu0 %v1545_v2  ;;  %v1384_v52 = vld [vmem:[#allocation5 + $0x90] sm:$0xff]   ;;  %v1386_v54 = vld [vmem:[#allocation5 + $0x98] sm:$0xff]   ;;  %v1387_v55 = vld [vmem:[#allocation2 + $0x20] sm:$0xff]   ;;  %p1468_p10 = scmp.ne.s32.totalorder %s1798_s25, %s1467_s6  ;;  %p1866_p1 = scmp.ne.s32.totalorder %s1853_s22, 0 }
  0x58   : > { %v1388_v56 = vld [vmem:[#allocation5 + $0xa0] sm:$0xff]   ;;  %v1389_v57 = vld [vmem:[#allocation2 + $0x28] sm:$0xff]   ;;  %v1391_v60 = vld [vmem:[#allocation2 + $0x30] sm:$0xff]   ;;  %s1551_s7 = smov [#allocation7]  }
  0x59   : > { %223 = vperm.xlu1 %1356, %v204_v4   ;;  %211 = vperm.xlu0 %1355, %v204_v4   ;;  %v1390_v58 = vld [vmem:[#allocation5 + $0xa8] sm:$0xff]   ;;  %v1392_v61 = vld [vmem:[#allocation5 + $0xb0] sm:$0xff]   ;;  %v1393_v62 = vld [vmem:[#allocation2 + $0x38] sm:$0xff]   ;;  %p1469_p2 = pnand %p1468_p10, %p1866_p1  ;;  %s1471_s26 = sshll.u32 %s1551_s7, 4  ;;  %s1472_s26 = int_to_ptr.vmem [resolvable:$false] %s1471_s26 }
  0x5a   : > { %1150 = vmatpush3.bf16.msra.mxu1 %v1367_v9  ;;  %1210 = vmatpush3.bf16.msra.mxu0 %v1368_v10  ;;  %v1394_v0 = vld [vmem:[#allocation5 + $0xb8] sm:$0xff]   ;;  %v1395_v1 = vld [vmem:[#allocation5 + $0x40] sm:$0xff]   ;;  %v1397_v5 = vld [vmem:[#allocation5 + $0x48] sm:$0xff]   ;;  %s1473_s8 = scalar_lea.vmem %s1472_s26, 512  ;;  %p1474_p4 = scmp.lt.s32.totalorder %s1798_s25, %s1472_s26 }
  0x5b   : > { %1151 = vmatprep.subr.bf16.mxu1 %v1545_v2  ;;  %1211 = vmatprep.subr.bf16.mxu0 %v1545_v2  ;;  %v1398_v6 = vld [vmem:[#allocation2 + $0x88] sm:$0xff]   ;;  %v1399_v7 = vld [vmem:[#allocation5 + $0x50] sm:$0xff]   ;;  %v1401_v9 = vld [vmem:[#allocation5 + $0x58] sm:$0xff]   ;;  %p1470_p3 = pneg %p1469_p2  ;;  %p1475_p7 = scmp.lt.s32.totalorder %s1473_s8, %s1467_s6 }
  0x5c   : > { %v1400_v8 = vld [vmem:[#allocation2 + $0x90] sm:$0xff]   ;;  %v1402_v10 = vld [vmem:[#allocation2 + $0x98] sm:$0xff]  }
  0x5d   : > { %1358 = vset.pattern.permute.xlu1 %v1546_v11  ;;  %1357 = vset.pattern.permute.xlu0 %v1546_v11  ;;  %v1403_v11 = vld [vmem:[#allocation5 + $0x60] sm:$0xff]   ;;  %p1476_p8 = por %p1475_p7, %p1474_p4 }
  0x5e   : > { %237 = vperm.xlu1 %1358, %v204_v4   ;;  %234 = vperm.xlu0 %1357, %v203_v3  }
  0x5f   : > { %1152 = vmatpush3.bf16.msra.mxu1 %v1369_v12  ;;  %1212 = vmatpush3.bf16.msra.mxu0 %v1370_v13  ;;  %v1404_v12 = vld [vmem:[#allocation2 + $0xa0] sm:$0xff]   ;;  %v1405_v13 = vld [vmem:[#allocation5 + $0x68] sm:$0xff]   ;;  %p1477_p11 = pnand %p1476_p8, %p1470_p3 }
  0x60   : > { %1153 = vmatprep.subr.bf16.mxu1 %v1545_v2  ;;  %1213 = vmatprep.subr.bf16.mxu0 %v1545_v2 }
  0x62   : > { %1359 = vset.pattern.permute.xlu1 %v1547_v14  ;;  %1360 = vset.pattern.permute.xlu0 %v1547_v14  ;;  %v1406_v14 = vld [vmem:[#allocation2 + $0xa8] sm:$0xff]  }
  0x63   : > { %249 = vperm.xlu1 %1359, %v203_v3   ;;  %252 = vperm.xlu0 %1360, %v204_v4  }
  0x64   : > { %1154 = vmatpush3.bf16.msra.mxu1 %v1371_v15  ;;  %1214 = vmatpush3.bf16.msra.mxu0 %v1372_v16  ;;  %v1407_v15 = vld [vmem:[#allocation5 + $0x70] sm:$0xff]  }
  0x65   : > { %1155 = vmatprep.subr.bf16.mxu1 %v1545_v2  ;;  %1215 = vmatprep.subr.bf16.mxu0 %v1545_v2  ;;  %v1408_v16 = vld [vmem:[#allocation2 + $0xb0] sm:$0xff]  }
  0x67   : > { %1361 = vset.pattern.permute.xlu1 %v1549_v17  ;;  %1362 = vset.pattern.permute.xlu0 %v1549_v17  ;;  %v1409_v17 = vld [vmem:[#allocation5 + $0x78] sm:$0xff]  }
  0x68   : > { %262 = vperm.xlu1 %1361, %v203_v3   ;;  %1156 = vmatpush3.bf16.msra.mxu1 %v1373_v18  ;;  %v1396_v3 = vld [vmem:[#allocation2 + $0x80] sm:$0xff]   ;;  %v1410_v18 = vld [vmem:[#allocation2 + $0xb8] sm:$0xff]  }
  0x69   : > { %1216 = vmatpush3.bf16.msra.mxu0 %v1374_v19  ;;  %1157 = vmatprep.subr.bf16.mxu1 %v1545_v2 }
  0x6a   : > { %1217 = vmatprep.subr.bf16.mxu0 %v1545_v2 }
  0x6c   : > { %265 = vperm.xlu1 %1361, %v204_v4   ;;  %1158 = vmatpush3.bf16.msra.mxu1 %v1375_v20 }
  0x6d   : > { %1218 = vmatpush3.bf16.msra.mxu0 %v1376_v21  ;;  %1159 = vmatprep.subr.bf16.mxu1 %v1545_v2 }
  0x6e   : > { %1219 = vmatprep.subr.bf16.mxu0 %v1545_v2 }
  0x70   : > { %1160 = vmatpush3.bf16.msra.mxu1 %v1377_v22 }
  0x71   : > { %1220 = vmatpush3.bf16.msra.mxu0 %v1378_v23  ;;  %1165 = vmatprep.subr.bf16.mxu1 %v1545_v2 }
  0x72   : > { %1225 = vmatprep.subr.bf16.mxu0 %v1545_v2 }
  0xd4   : > { %v221_v26 = vpop.permute.xlu1 %220  ;;  %v209_v27 = vpop.permute.xlu0 %208 }
  0xd5   : > { %vm225_vm1 = vcmp.eq.s32.totalorder %v1720_v25, %v221_v26  ;;  %vm213_vm2 = vcmp.eq.s32.totalorder %v1720_v25, %v209_v27 }
  0xd6   : > { %v1021_v30 = vsel %vm225_vm1, 1.0, %v1545_v2  ;;  %v1019_v31 = vsel %vm213_vm2, 1.0, %v1545_v2 }
  0xd7   : > { %v231_v36 = vadd.f32 %v1021_v30, %v1019_v31 }
  0xd8   : > { %v224_v28 = vpop.permute.xlu1 %223  ;;  %v212_v29 = vpop.permute.xlu0 %211 }
  0xd9   : > { %vm226_vm3 = vcmp.eq.s32.totalorder %v1720_v25, %v224_v28  ;;  %vm214_vm4 = vcmp.eq.s32.totalorder %v1720_v25, %v212_v29 }
  0xda   : > { %v1022_v32 = vsel %vm226_vm3, 1.0, %v1545_v2  ;;  %v1020_v33 = vsel %vm214_vm4, 1.0, %v1545_v2 }
  0xdb   : > { %v232_v37 = vadd.f32 %v1022_v32, %v1020_v33 }
  0xdd   : > { %v238_v34 = vpop.permute.xlu1 %237  ;;  %v235_v35 = vpop.permute.xlu0 %234 }
  0xde   : > { %vm240_vm5 = vcmp.eq.s32.totalorder %v1720_v25, %v238_v34  ;;  %vm239_vm6 = vcmp.eq.s32.totalorder %v1720_v25, %v235_v35 }
  0xdf   : > { %v1024_v38 = vsel %vm240_vm5, 1.0, %v1545_v2  ;;  %v1023_v39 = vsel %vm239_vm6, 1.0, %v1545_v2 }
  0xe0   : > { %v246_v40 = vadd.f32 %v1024_v38, %v232_v37  ;;  %v245_v41 = vadd.f32 %v1023_v39, %v231_v36 }
  0xe2   : > { %v250_v43 = vpop.permute.xlu1 %249  ;;  %v253_v44 = vpop.permute.xlu0 %252  ;;  %v247_v45 = vpack.c.bf16 %v246_v40, %v245_v41 }
  0xe3   : > { %vm254_vm7 = vcmp.eq.s32.totalorder %v1720_v25, %v250_v43  ;;  %vm255_vm8 = vcmp.eq.s32.totalorder %v1720_v25, %v253_v44 }
  0xe4   : > { %vm1736_vm9 = vmpackc.low %vm255_vm8, %vm254_vm7  ;;  %1162 = vmatmul.mubr.bf16.vlgmr.msra.gmra.mrb[0].mxu1 %v247_v45 }
  0xe5   : > { %1166 = vmatpush3.bf16.msra.mxu1 %v1379_v42  ;;  %1222 = vmatmul.mubr.msk.bf16.vlgmr.msra.gmra.mrb[0].mxu0 %vm1736_vm9, %v1550_v48 }
  0xe6   : > { %1226 = vmatpush3.bf16.msra.mxu0 %v1380_v46  ;;  %1167 = vmatprep.subr.bf16.mxu1 %v1545_v2 }
  0xe7   : > { %1227 = vmatprep.subr.bf16.mxu0 %v1545_v2  ;;  %1181 = vmatprep.mubr.msk.bf16.mxu1 %vm1548_vm0, %v1545_v2  ;;  %v263_v59 = vpop.permute.xlu1 %262 }
  0xe8   : > { %1241 = vmatprep.mubr.msk.bf16.mxu0 %vm1548_vm0, %v1545_v2  ;;  %vm267_vm10 = vcmp.eq.s32.totalorder %v1720_v25, %v263_v59 }
  0xe9   : > { %1168 = vmatpush3.bf16.msra.mxu1 %v1381_v49 }
  0xea   : > { %1228 = vmatpush3.bf16.msra.mxu0 %v1382_v50  ;;  %1169 = vmatprep.subr.bf16.mxu1 %v1545_v2 }
  0xeb   : > { %1229 = vmatprep.subr.bf16.mxu0 %v1545_v2  ;;  %v266_v63 = vpop.permute.xlu1 %265 }
  0xec   : > { %vm268_vm11 = vcmp.eq.s32.totalorder %v1720_v25, %v266_v63 }
  0xed   : > { %1170 = vmatpush3.bf16.msra.mxu1 %v1383_v51  ;;  %vm1765_vm12 = vmpackc.low %vm268_vm11, %vm267_vm10 }
  0xee   : > { %1230 = vmatpush3.bf16.msra.mxu0 %v1384_v52  ;;  %1171 = vmatprep.subr.bf16.mxu1 %v1545_v2 }
  0xef   : > { %1231 = vmatprep.subr.bf16.mxu0 %v1545_v2 }
  0xf1   : > { %1172 = vmatpush3.bf16.msra.mxu1 %v1385_v53 }
  0xf2   : > { %1232 = vmatpush3.bf16.msra.mxu0 %v1386_v54  ;;  %1173 = vmatprep.subr.bf16.mxu1 %v1545_v2 }
  0xf3   : > { %1233 = vmatprep.subr.bf16.mxu0 %v1545_v2 }
  0xf5   : > { %1174 = vmatpush3.bf16.msra.mxu1 %v1387_v55 }
  0xf6   : > { %1234 = vmatpush3.bf16.msra.mxu0 %v1388_v56  ;;  %1175 = vmatprep.subr.bf16.mxu1 %v1545_v2 }
  0xf7   : > { %1235 = vmatprep.subr.bf16.mxu0 %v1545_v2 }
  0xf9   : > { %1176 = vmatpush3.bf16.msra.mxu1 %v1389_v57 }
  0xfa   : > { %1236 = vmatpush3.bf16.msra.mxu0 %v1390_v58  ;;  %1177 = vmatprep.subr.bf16.mxu1 %v1545_v2 }
  0xfb   : > { %1237 = vmatprep.subr.bf16.mxu0 %v1545_v2 }
  0xfd   : > { %1178 = vmatpush3.bf16.msra.mxu1 %v1391_v60 }
  0xfe   : > { %1238 = vmatpush3.bf16.msra.mxu0 %v1392_v61  ;;  %1179 = vmatprep.subr.bf16.mxu1 %v1545_v2 }
  0xff   : > { %1239 = vmatprep.subr.bf16.mxu0 %v1545_v2 }
 0x101   : > { %1180 = vmatpush3.bf16.msra.mxu1 %v1393_v62 }
 0x102   : > { %1240 = vmatpush3.bf16.msra.mxu0 %v1394_v0  ;;  %1185 = vmatprep.subr.bf16.mxu1 %v1545_v2 }
 0x103   : > { %1245 = vmatprep.subr.bf16.mxu0 %v1545_v2 }
 0x104   : > { %1182 = vmatmul.mubr.bf16.vlgmr.msra.gmra.mrb[0].mxu1 %v247_v45 }
 0x105   : > { %1186 = vmatpush3.bf16.msra.mxu1 %v1395_v1  ;;  %1242 = vmatmul.mubr.msk.bf16.vlgmr.msra.gmra.mrb[0].mxu0 %vm1765_vm12, %v1550_v48 }
 0x106   : > { %1246 = vmatpush3.bf16.msra.mxu0 %v1396_v3  ;;  %1187 = vmatprep.subr.bf16.mxu1 %v1545_v2 }
 0x107   : > { %1247 = vmatprep.subr.bf16.mxu0 %v1545_v2  ;;  %1201 = vmatprep.mubr.msk.bf16.mxu1 %vm1548_vm0, %v1545_v2 }
 0x108   : > { %1261 = vmatprep.mubr.msk.bf16.mxu0 %vm1548_vm0, %v1545_v2 }
 0x109   : > { %1188 = vmatpush3.bf16.msra.mxu1 %v1397_v5 }
 0x10a   : > { %1248 = vmatpush3.bf16.msra.mxu0 %v1398_v6  ;;  %1189 = vmatprep.subr.bf16.mxu1 %v1545_v2 }
 0x10b   : > { %1249 = vmatprep.subr.bf16.mxu0 %v1545_v2 }
 0x10d   : > { %1190 = vmatpush3.bf16.msra.mxu1 %v1399_v7 }
 0x10e   : > { %1250 = vmatpush3.bf16.msra.mxu0 %v1400_v8  ;;  %1191 = vmatprep.subr.bf16.mxu1 %v1545_v2 }
 0x10f   : > { %1251 = vmatprep.subr.bf16.mxu0 %v1545_v2 }
 0x111   : > { %1192 = vmatpush3.bf16.msra.mxu1 %v1401_v9 }
 0x112   : > { %1252 = vmatpush3.bf16.msra.mxu0 %v1402_v10  ;;  %1193 = vmatprep.subr.bf16.mxu1 %v1545_v2 }
 0x113   : > { %1253 = vmatprep.subr.bf16.mxu0 %v1545_v2 }
 0x115   : > { %1194 = vmatpush3.bf16.msra.mxu1 %v1403_v11 }
 0x116   : > { %1254 = vmatpush3.bf16.msra.mxu0 %v1404_v12  ;;  %1195 = vmatprep.subr.bf16.mxu1 %v1545_v2 }
 0x117   : > { %1255 = vmatprep.subr.bf16.mxu0 %v1545_v2 }
 0x119   : > { %1196 = vmatpush3.bf16.msra.mxu1 %v1405_v13 }
 0x11a   : > { %1256 = vmatpush3.bf16.msra.mxu0 %v1406_v14  ;;  %1197 = vmatprep.subr.bf16.mxu1 %v1545_v2 }
 0x11b   : > { %1257 = vmatprep.subr.bf16.mxu0 %v1545_v2 }
 0x11d   : > { %1198 = vmatpush3.bf16.msra.mxu1 %v1407_v15 }
 0x11e   : > { %1258 = vmatpush3.bf16.msra.mxu0 %v1408_v16  ;;  %1199 = vmatprep.subr.bf16.mxu1 %v1545_v2 }
 0x11f   : > { %1259 = vmatprep.subr.bf16.mxu0 %v1545_v2 }
 0x121   : > { %1200 = vmatpush3.bf16.msra.mxu1 %v1409_v17 }
 0x122   : > { %1260 = vmatpush3.bf16.msra.mxu0 %v1410_v18 }
 0x124   : > { %1202 = vmatmul.mubr.msk.bf16.vlgmr.msra.gmra.mrb[0].mxu1 %vm1736_vm9, %v1550_v48 }
 0x125   : > { %1262 = vmatmul.mubr.msk.bf16.vlgmr.msra.gmra.mrb[0].mxu0 %vm1765_vm12, %v1550_v48 }
 0x1f7   : > { %v598_v19 = vpop.f32.mrb[0].mxu1 }
 0x1f8   : > { %v1203_v20 = vpop.f32.mrb[1].mxu1  ;;  %v899_v21 = vpop.f32.mrb[0].mxu0 }
 0x1f9   : > { %v1265_v2 = vadd.f32 %v899_v21, %v598_v19  ;;  %v601_v22 = vpop.f32.mrb[2].mxu1  ;;  %v1263_v23 = vpop.f32.mrb[1].mxu0 }
 0x1fa   : > { %v1204_v24 = vpop.f32.mrb[3].mxu1  ;;  %v902_v25 = vpop.f32.mrb[2].mxu0 }
 0x1fb   : > { %908 = vst [vmem:[%s194_s20] sm:$0xff] %v1265_v2  ;;  %v1266_v26 = vadd.f32 %v902_v25, %v601_v22  ;;  %v1264_v27 = vpop.f32.mrb[3].mxu0 }
 0x1fd   : > { %909 = vst [vmem:[%s194_s20 + $0x8] sm:$0xff] %v1266_v26 }
 0x1fe   : > { %1480 = shalt.err (!%p1477_p11)
}
 0x1ff   : > { %s1481_s9 = scalar_lea.hbm %s1803_s5, 256  ;;  %s1485_s29 = scalar_lea.hbm %s1849_s3, 512 }
 0x200   : > { %p1482_p13 = scmp.ne.s32.totalorder %s1803_s5, %s1481_s9  ;;  %p1486_p6 = scmp.lt.u32.totalorder %s1803_s5, %s1849_s3 }
 0x201   : > { %p1487_p9 = scmp.lt.u32.totalorder %s1485_s29, %s1481_s9  ;;  %p1489_p10 = scmp.lt.u32.totalorder %s1481_s9, %s1803_s5 }
 0x202   : > { %p1483_p5 = pnand %p1482_p13, %p1866_p1 }
 0x203   : > { %p1488_p12 = por %p1487_p9, %p1486_p6 }
 0x204   : > { %p1484_p0 = pneg %p1483_p5 }
 0x205   : > { %p1490_p2 = por %p1489_p10, %p1488_p12 }
 0x207   : > { %p1491_p3 = pnand %p1490_p2, %p1484_p0 }
 0x209   : > { %1494 = shalt.err (!%p1491_p3)
}
 0x20a   : > { %s1552_s17 = smov 128   ;;  %s1553_s19 = smov 8  }
 0x20b   : > { %1291 = dma.vmem_to_hbm [thread:$0]  (%p1866_p1), %s1798_s25, 256, %s1803_s5, %s1805_s16, %s1552_s17, %s1552_s17, %s1553_s19  }
 0x20c PF: > { %p1308_p4 = scmp.ge.s32.totalorder %s1537_s15, 2  ;;  %s939_s20 = sand.u32 1, %s1525_s12  }
 0x20d   : > { %p1867_p7 = scmp.ne.s32.totalorder %s1854_s23, 0  ;;  %s940_s28 = scalar_lea.sflag [#allocation4], %s939_s20 }
 0x20f   : > { %p1301_p8 = pnand %p1308_p4, %p1867_p7 }
 0x211   : > { %1520 = dma.done.wait (!%p1301_p8), %s940_s28, 256  }
 0x212   : > { %1522 = vsyncadd (!%p1301_p8), %s940_s28, 4294967040  ;;  %p15_p11 = scmp.ge.s32.totalorder %s1599_s18, 4   ;;  %s1868_s12 = smov %s1529_s13 }
 0x213   : > { %s1869_s13 = smov %s1533_s14  ;;  %s1870_s14 = smov %s1610_s21 }
 0x214   : > { %s1871_s15 = smov %s1599_s18  ;;  %17 = sbr.rel (!%p15_p11) target bundleno = 5 (0x5), region = 76 }
 0x21b   :  { %945 = vsyncpa [#allocation3], 1 }
 0x21c   :  { %947 = vsyncpa [#allocation3 + $0x1], 1 }
 0x21d   :  { %948 = vsyncpa [#allocation6], 1 }
 0x21e   :  { %949 = vsyncpa [#allocation4], 1 }
 0x21f   :  { %951 = vsyncpa [#allocation4 + $0x1], 1 }

</bundles_post_ra>
